<compile_context>
chip_gen: v6e
topology: v6e:2x2x1
jax: 0.10.0
libtpu: 0.0.40
codegen_flags: <defaults>
</compile_context>

<pallas_src>
import functools

import jax
import jax.numpy as jnp
import numpy as np
from jax.experimental import pallas as pl
from jax.experimental.pallas import tpu as pltpu

EPS = 1e-5
KSIZE = 3           # kernel_size used throughout the module
PAD = KSIZE // 2
SLOPE = 0.01        # leaky-relu slope inside ConvBlockRes1D


# ----------------------------------------------------------------------------
# Fused Pallas kernel: entire UpBlockRes1D forward (activations live in VMEM)
# ----------------------------------------------------------------------------
def _up_block_kernel(*refs, names, meta):
    N, L_in, L_out = meta
    n_in = len(names)
    ins = dict(zip(names, refs[:n_in]))
    out_ref = refs[n_in]
    rhs_ref = refs[n_in + 1]          # VMEM scratch for the stacked conv RHS
    f32 = jnp.float32

    def bn_act(x, g_ref, b_ref, neg_slope, count):
        """BatchNorm1d (training-mode batch stats, biased var) + (leaky) ReLU, all f32."""
        inv = 1.0 / count
        mean = jnp.sum(x, axis=1, keepdims=True) * inv
        d = x - mean
        var = jnp.sum(d * d, axis=1, keepdims=True) * inv
        y = d * jax.lax.rsqrt(var + EPS) * g_ref[...].astype(f32) + b_ref[...].astype(f32)
        return jnp.where(y >= 0, y, neg_slope * y)

    def build_rhs(parts, L):
        """Stack K shifted copies of the (channel-concatenated) input into rhs_ref.

        Row k*C_tot + c, column n*L + j holds x[c, n*L + j + k - PAD] (zero outside the valid
        range of batch n), so a single (C_out, K*C_tot) @ (K*C_tot, N*L) matmul is the conv.
        """
        ctot = sum(int(p.shape[0]) for p in parts)
        for k in range(KSIZE):
            shift = k - PAD
            j_lo = max(0, -shift)
            j_hi = L - max(0, shift)
            off = 0
            for part in parts:
                ci = int(part.shape[0])
                r0 = k * ctot + off
                for n in range(N):
                    base = n * L
                    rhs_ref[r0:r0 + ci, base + j_lo:base + j_hi] = \
                        part[:, base + j_lo + shift:base + j_hi + shift]
                    if j_lo > 0:
                        rhs_ref[r0:r0 + ci, base:base + j_lo] = jnp.zeros((ci, j_lo), f32)
                    if j_hi < L:
                        rhs_ref[r0:r0 + ci, base + j_hi:base + L] = \
                            jnp.zeros((ci, L - j_hi), f32)
                off += ci
        return ctot

    def conv(parts, w_ref, L):
        ctot = build_rhs(parts, L)
        return jnp.dot(w_ref[...].astype(f32), rhs_ref[0:KSIZE * ctot, 0:N * L],
                       preferred_element_type=f32)

    def conv_block(parts, pfx, L, has_shortcut):
        """ConvBlockRes1D: bn1+lrelu -> conv1 -> bn2+lrelu -> conv2 (+ shortcut/residual)."""
        count = float(N * L)
        acts = [bn_act(v, g, b, SLOPE, count) for (v, g, b) in parts]
        h = conv(acts, ins[pfx + "conv1_w"], L)
        h = bn_act(h, ins[pfx + "bn2_g"], ins[pfx + "bn2_b"], SLOPE, count)
        y = conv([h], ins[pfx + "conv2_w"], L)
        if has_shortcut:                       # 1x1 conv (with bias) on the raw origin
            w_sc = ins[pfx + "sc_w"][...].astype(f32)
            sc = ins[pfx + "sc_b"][...].astype(f32)
            off = 0
            for (v, _, _) in parts:
                ci = int(v.shape[0])
                sc = sc + jnp.dot(w_sc[:, off:off + ci], v, preferred_element_type=f32)
                off += ci
            return y + sc
        return y + parts[0][0]

    # ---- x = conv1(relu_(bn1(input_tensor))): BN+ReLU fused with ConvTranspose1d ----
    x_in = ins["x"][...].astype(f32)                                    # (C_in, N*L_in)
    h0 = bn_act(x_in, ins["bn1_g"], ins["bn1_b"], 0.0, float(N * L_in))
    wT = ins["convT_w"]                                                 # (K, C_out, C_in)
    S = ins["convT_S"]                                                  # (K, N*L_in, N*L_out)
    c_out = wT.shape[1]
    up = jnp.zeros((c_out, N * L_out), f32)
    for k in range(KSIZE):
        zk = jnp.dot(wT[k].astype(f32), h0, preferred_element_type=f32)       # (C_out, N*L_in)
        up = up + jnp.dot(zk, S[k].astype(f32), preferred_element_type=f32)   # (C_out, N*L_out)
    # TODO(synk): at production L, replace the scatter matmul by polyphase taps + strided
    # stores, add a length-tiled grid with K-1 halos (sized per-chip VMEM, 'parallel' for
    # v7x dual-TC), and cast activations/weights to bf16 with f32 accumulation.

    # ---- torch.cat((x, concat_tensor), 1) absorbed into block2 (split channel groups) ----
    cat = ins["cat"][...].astype(f32)                                   # (C_out, N*L_out)
    x = conv_block([(up, ins["b2_bn1_g_a"], ins["b2_bn1_b_a"]),
                    (cat, ins["b2_bn1_g_b"], ins["b2_bn1_b_b"])],
                   "b2_", L_out, has_shortcut=True)
    for pfx in ("b3_", "b4_", "b5_"):
        x = conv_block([(x, ins[pfx + "bn1_g"], ins[pfx + "bn1_b"])],
                       pfx, L_out, has_shortcut=False)

    out_ref[...] = x.astype(out_ref.dtype)


# ----------------------------------------------------------------------------
# Wrapper
# ----------------------------------------------------------------------------
_INPUT_NAMES = (
    "x", "cat", "bn1_g", "bn1_b", "convT_w", "convT_S",
    "b2_bn1_g_a", "b2_bn1_b_a", "b2_bn1_g_b", "b2_bn1_b_b",
    "b2_conv1_w", "b2_bn2_g", "b2_bn2_b", "b2_conv2_w", "b2_sc_w", "b2_sc_b",
) + tuple(pfx + s for pfx in ("b3_", "b4_", "b5_")
          for s in ("bn1_g", "bn1_b", "conv1_w", "bn2_g", "bn2_b", "conv2_w"))


def up_block_res1d(prepared, input_tensor, concat_tensor, stride):
    N, c_in, L_in = input_tensor.shape
    _, c_out, L_cat = concat_tensor.shape
    L_out = (L_in - 1) * stride + KSIZE
    assert L_cat == L_out, (L_cat, L_out)

    # lane-dense (C, N*L) layout for all activations
    x = jnp.transpose(input_tensor, (1, 0, 2)).reshape(c_in, N * L_in)
    cat = jnp.transpose(concat_tensor, (1, 0, 2)).reshape(c_out, N * L_out)

    # Per-tap scatter matrices for ConvTranspose1d (block-diagonal over batch);
    # tiny compile-time constants built on host.
    S = np.zeros((KSIZE, N * L_in, N * L_out), np.float32)
    for k in range(KSIZE):
        for n in range(N):
            for j in range(L_in):
                S[k, n * L_in + j, n * L_out + j * stride + k] = 1.0

    tensors = {"x": x, "cat": cat, "convT_S": jnp.asarray(S), **prepared}
    arrays = [tensors[name] for name in _INPUT_NAMES]

    # Rough cost hint so XLA schedules around the single custom call sensibly.
    nl_i, nl_o = N * L_in, N * L_out
    flops = 2 * KSIZE * c_out * nl_i * (c_in + nl_o)                                # convT
    flops += 2 * nl_o * c_out * (KSIZE * 2 * c_out + KSIZE * c_out + 2 * c_out)     # block2
    flops += 3 * 2 * (2 * nl_o * c_out * KSIZE * c_out)                             # blocks 3-5
    bytes_accessed = 4 * (sum(int(np.prod(a.shape)) for a in arrays) + c_out * nl_o)
    cost = pl.CostEstimate(flops=int(flops),
                           transcendentals=int(9 * max(c_in, 2 * c_out)),
                           bytes_accessed=int(bytes_accessed))

    out = pl.pallas_call(
        functools.partial(_up_block_kernel, names=_INPUT_NAMES, meta=(N, L_in, L_out)),
        out_shape=jax.ShapeDtypeStruct((c_out, N * L_out), input_tensor.dtype),
        scratch_shapes=[pltpu.VMEM((KSIZE * 2 * c_out, N * L_out), jnp.float32)],
        cost_estimate=cost,
    )(*arrays)
    return jnp.transpose(out.reshape(c_out, N, L_out), (1, 0, 2))


# ----------------------------------------------------------------------------
# Host-side, one-time weight re-layout (outside the jitted forward path)
# ----------------------------------------------------------------------------
def prepare_params(params):
    def colw(w):          # torch Conv1d weight (C_out, C_in, K) -> (C_out, K*C_in)
        w = np.asarray(w, np.float32)
        co, ci, k = w.shape
        return np.ascontiguousarray(np.transpose(w, (0, 2, 1)).reshape(co, k * ci))

    def vec(v):
        v = np.asarray(v, np.float32)
        return v.reshape(v.shape[0], 1)

    out = {
        "bn1_g": vec(params["bn1_g"]),
        "bn1_b": vec(params["bn1_b"]),
        # ConvTranspose1d weight (C_in, C_out, K) -> per-tap transposed stack (K, C_out, C_in)
        "convT_w": np.ascontiguousarray(
            np.transpose(np.asarray(params["convT_w"], np.float32), (2, 1, 0))),
    }

    def block_common(blk, pfx):
        return {
            pfx + "conv1_w": colw(blk["conv1_w"]),
            pfx + "bn2_g": vec(blk["bn2_g"]), pfx + "bn2_b": vec(blk["bn2_b"]),
            pfx + "conv2_w": colw(blk["conv2_w"]),
        }

    b2 = params["block2"]
    c_out = int(b2["conv1_w"].shape[0])
    g = np.asarray(b2["bn1_g"], np.float32)
    b = np.asarray(b2["bn1_b"], np.float32)
    out.update(block_common(b2, "b2_"))
    out.update({
        "b2_bn1_g_a": vec(g[:c_out]), "b2_bn1_b_a": vec(b[:c_out]),
        "b2_bn1_g_b": vec(g[c_out:]), "b2_bn1_b_b": vec(b[c_out:]),
        "b2_sc_w": np.asarray(b2["sc_w"], np.float32).reshape(c_out, -1),
        "b2_sc_b": vec(b2["sc_b"]),
    })
    for name, pfx in (("block3", "b3_"), ("block4", "b4_"), ("block5", "b5_")):
        blk = params[name]
        out.update(block_common(blk, pfx))
        out.update({pfx + "bn1_g": vec(blk["bn1_g"]), pfx + "bn1_b": vec(blk["bn1_b"])})
    return out


# ----------------------------------------------------------------------------
# Deterministic parameter init (torch-layout, shapes per the module __init__)
# ----------------------------------------------------------------------------
def make_params(key, in_channels, out_channels):
    keys = iter(jax.random.split(key, 64))

    def nrm(shape, scale=0.1):
        return scale * jax.random.normal(next(keys), shape, jnp.float32)

    def block(ci, co):
        p = dict(
            bn1_g=1.0 + nrm((ci,)), bn1_b=nrm((ci,)),
            conv1_w=nrm((co, ci, 3)),
            bn2_g=1.0 + nrm((co,)), bn2_b=nrm((co,)),
            conv2_w=nrm((co, co, 3)),
        )
        if ci != co:
            p["sc_w"] = nrm((co, ci, 1))
            p["sc_b"] = nrm((co,))
        return p

    return dict(
        bn1_g=1.0 + nrm((in_channels,)), bn1_b=nrm((in_channels,)),
        convT_w=nrm((in_channels, out_channels, 3)),
        block2=block(2 * out_channels, out_channels),
        block3=block(out_channels, out_channels),
        block4=block(out_channels, out_channels),
        block5=block(out_channels, out_channels),
    )


# ----------------------------------------------------------------------------
# Pure-JAX reference (sanity check)
# ----------------------------------------------------------------------------
def _ref_bn_act(x, g, b, slope):
    mean = x.mean(axis=(0, 2), keepdims=True)
    var = ((x - mean) ** 2).mean(axis=(0, 2), keepdims=True)
    y = (x - mean) / jnp.sqrt(var + EPS) * g[None, :, None] + b[None, :, None]
    return jnp.where(y >= 0, y, slope * y)


def _ref_conv(x, w_oik, bias=None, res=None):
    pad = w_oik.shape[2] // 2
    y = jax.lax.conv_general_dilated(
        x, w_oik, (1,), [(pad, pad)], dimension_numbers=("NCH", "OIH", "NCH"),
        precision=jax.lax.Precision.HIGHEST)
    if bias is not None:
        y = y + bias[None, :, None]
    if res is not None:
        y = y + res
    return y


def _ref_convT(x, w_iok, stride):
    k = w_iok.shape[2]
    w = jnp.transpose(w_iok, (1, 0, 2))[:, :, ::-1]
    return jax.lax.conv_general_dilated(
        x, w, (1,), [(k - 1, k - 1)], lhs_dilation=(stride,),
        dimension_numbers=("NCH", "OIH", "NCH"), precision=jax.lax.Precision.HIGHEST)


def _ref_block(x, p, slope=0.01):
    origin = x
    h = _ref_conv(_ref_bn_act(x, p["bn1_g"], p["bn1_b"], slope), p["conv1_w"])
    h = _ref_bn_act(h, p["bn2_g"], p["bn2_b"], slope)
    if "sc_w" in p:
        sc = _ref_conv(origin, p["sc_w"], bias=p["sc_b"])
        return _ref_conv(h, p["conv2_w"], res=sc)
    return _ref_conv(h, p["conv2_w"], res=origin)


def _ref_forward(params, x_in, x_cat, stride):
    h = _ref_bn_act(x_in, params["bn1_g"], params["bn1_b"], 0.0)
    x = _ref_convT(h, params["convT_w"], stride)
    x = jnp.concatenate([x, x_cat], axis=1)
    for name in ("block2", "block3", "block4", "block5"):
        x = _ref_block(x, params[name])
    return x


# ----------------------------------------------------------------------------
if __name__ == "__main__":
    IN_CH, OUT_CH, STRIDE = 4, 4, 2
    N, L = 2, 8
    L_OUT = (L - 1) * STRIDE + KSIZE  # ConvTranspose1d output length = 17

    key = jax.random.PRNGKey(0)
    kp, kx, kc = jax.random.split(key, 3)
    params = make_params(kp, IN_CH, OUT_CH)
    prepared = prepare_params(params)   # host-side weight re-layout, done once, outside jit

    input_tensor = jax.random.normal(kx, (N, IN_CH, L), jnp.float32)
    concat_tensor = jax.random.normal(kc, (N, OUT_CH, L_OUT), jnp.float32)

    fwd = jax.jit(functools.partial(up_block_res1d, stride=STRIDE))
    out = jax.block_until_ready(fwd(prepared, input_tensor, concat_tensor))

    ref = _ref_forward(params, input_tensor, concat_tensor, STRIDE)
    assert out.shape == (N, OUT_CH, L_OUT), out.shape
    np.testing.assert_allclose(np.asarray(out), np.asarray(ref), rtol=1e-2, atol=1e-2)

    print("KERNEL_OK")
</pallas_src>

<mosaic_0001>
module attributes {stable_mosaic.version = 11 : i64} {
  func.func @_up_block_kernel(%arg0: memref<4x16xf32, #tpu.memory_space<vmem>>, %arg1: memref<4x34xf32, #tpu.memory_space<vmem>>, %arg2: memref<4x1xf32, #tpu.memory_space<vmem>>, %arg3: memref<4x1xf32, #tpu.memory_space<vmem>>, %arg4: memref<3x4x4xf32, #tpu.memory_space<vmem>>, %arg5: memref<3x16x34xf32, #tpu.memory_space<vmem>>, %arg6: memref<4x1xf32, #tpu.memory_space<vmem>>, %arg7: memref<4x1xf32, #tpu.memory_space<vmem>>, %arg8: memref<4x1xf32, #tpu.memory_space<vmem>>, %arg9: memref<4x1xf32, #tpu.memory_space<vmem>>, %arg10: memref<4x24xf32, #tpu.memory_space<vmem>>, %arg11: memref<4x1xf32, #tpu.memory_space<vmem>>, %arg12: memref<4x1xf32, #tpu.memory_space<vmem>>, %arg13: memref<4x12xf32, #tpu.memory_space<vmem>>, %arg14: memref<4x8xf32, #tpu.memory_space<vmem>>, %arg15: memref<4x1xf32, #tpu.memory_space<vmem>>, %arg16: memref<4x1xf32, #tpu.memory_space<vmem>>, %arg17: memref<4x1xf32, #tpu.memory_space<vmem>>, %arg18: memref<4x12xf32, #tpu.memory_space<vmem>>, %arg19: memref<4x1xf32, #tpu.memory_space<vmem>>, %arg20: memref<4x1xf32, #tpu.memory_space<vmem>>, %arg21: memref<4x12xf32, #tpu.memory_space<vmem>>, %arg22: memref<4x1xf32, #tpu.memory_space<vmem>>, %arg23: memref<4x1xf32, #tpu.memory_space<vmem>>, %arg24: memref<4x12xf32, #tpu.memory_space<vmem>>, %arg25: memref<4x1xf32, #tpu.memory_space<vmem>>, %arg26: memref<4x1xf32, #tpu.memory_space<vmem>>, %arg27: memref<4x12xf32, #tpu.memory_space<vmem>>, %arg28: memref<4x1xf32, #tpu.memory_space<vmem>>, %arg29: memref<4x1xf32, #tpu.memory_space<vmem>>, %arg30: memref<4x12xf32, #tpu.memory_space<vmem>>, %arg31: memref<4x1xf32, #tpu.memory_space<vmem>>, %arg32: memref<4x1xf32, #tpu.memory_space<vmem>>, %arg33: memref<4x12xf32, #tpu.memory_space<vmem>>, %arg34: memref<4x34xf32, #tpu.memory_space<vmem>>, %arg35: memref<24x34xf32, #tpu.memory_space<vmem>>) attributes {dimension_semantics = [], scalar_prefetch = 0 : i64, scratch_operands = 1 : i64, tpu.core_type = #tpu.core_type<tc>} {
    %c0 = arith.constant 0 : index
    %c0_0 = arith.constant 0 : index
    %0 = vector.load %arg0[%c0, %c0_0] : memref<4x16xf32, #tpu.memory_space<vmem>>, vector<4x16xf32>
    %cst = arith.constant dense<0.000000e+00> : vector<4xf32>
    %1 = vector.multi_reduction <add>, %0, %cst [1] : vector<4x16xf32> to vector<4xf32>
    %2 = vector.shape_cast %1 : vector<4xf32> to vector<4x1xf32>
    %cst_1 = arith.constant 6.250000e-02 : f32
    %3 = vector.broadcast %cst_1 : f32 to vector<4x1xf32>
    %4 = arith.mulf %2, %3 : vector<4x1xf32>
    %5 = vector.broadcast %4 : vector<4x1xf32> to vector<4x16xf32>
    %6 = arith.subf %0, %5 : vector<4x16xf32>
    %7 = arith.mulf %6, %6 : vector<4x16xf32>
    %cst_2 = arith.constant dense<0.000000e+00> : vector<4xf32>
    %8 = vector.multi_reduction <add>, %7, %cst_2 [1] : vector<4x16xf32> to vector<4xf32>
    %9 = vector.shape_cast %8 : vector<4xf32> to vector<4x1xf32>
    %cst_3 = arith.constant 6.250000e-02 : f32
    %10 = vector.broadcast %cst_3 : f32 to vector<4x1xf32>
    %11 = arith.mulf %9, %10 : vector<4x1xf32>
    %cst_4 = arith.constant 9.99999974E-6 : f32
    %12 = vector.broadcast %cst_4 : f32 to vector<4x1xf32>
    %13 = arith.addf %11, %12 : vector<4x1xf32>
    %14 = math.rsqrt %13 : vector<4x1xf32>
    %15 = vector.broadcast %14 : vector<4x1xf32> to vector<4x16xf32>
    %16 = arith.mulf %6, %15 : vector<4x16xf32>
    %c0_5 = arith.constant 0 : index
    %c0_6 = arith.constant 0 : index
    %17 = vector.load %arg2[%c0_5, %c0_6] : memref<4x1xf32, #tpu.memory_space<vmem>>, vector<4x1xf32>
    %18 = vector.broadcast %17 : vector<4x1xf32> to vector<4x16xf32>
    %19 = arith.mulf %16, %18 : vector<4x16xf32>
    %c0_7 = arith.constant 0 : index
    %c0_8 = arith.constant 0 : index
    %20 = vector.load %arg3[%c0_7, %c0_8] : memref<4x1xf32, #tpu.memory_space<vmem>>, vector<4x1xf32>
    %21 = vector.broadcast %20 : vector<4x1xf32> to vector<4x16xf32>
    %22 = arith.addf %19, %21 : vector<4x16xf32>
    %cst_9 = arith.constant 0.000000e+00 : f32
    %23 = vector.broadcast %cst_9 : f32 to vector<4x16xf32>
    %24 = arith.cmpf oge, %22, %23 : vector<4x16xf32>
    %cst_10 = arith.constant 0.000000e+00 : f32
    %25 = vector.broadcast %cst_10 : f32 to vector<4x16xf32>
    %26 = arith.mulf %25, %22 : vector<4x16xf32>
    %27 = arith.select %24, %22, %26 : vector<4x16xi1>, vector<4x16xf32>
    %cst_11 = arith.constant 0.000000e+00 : f32
    %28 = vector.broadcast %cst_11 : f32 to vector<4x34xf32>
    %c0_12 = arith.constant 0 : index
    %c0_13 = arith.constant 0 : index
    %c0_14 = arith.constant 0 : index
    %29 = vector.load %arg4[%c0_12, %c0_13, %c0_14] : memref<3x4x4xf32, #tpu.memory_space<vmem>>, vector<1x4x4xf32>
    %30 = vector.shape_cast %29 : vector<1x4x4xf32> to vector<4x4xf32>
    %cst_15 = arith.constant dense<0.000000e+00> : vector<4x16xf32>
    %31 = tpu.matmul %30, %27, %cst_15 {dimension_numbers = #tpu.dot_dimension_numbers<[1], [0], [0], [1], [0, 0, 1, 1], [], []>} : vector<4x4xf32>, vector<4x16xf32>, vector<4x16xf32> -> vector<4x16xf32>
    %c0_16 = arith.constant 0 : index
    %c0_17 = arith.constant 0 : index
    %c0_18 = arith.constant 0 : index
    %32 = vector.load %arg5[%c0_16, %c0_17, %c0_18] : memref<3x16x34xf32, #tpu.memory_space<vmem>>, vector<1x16x34xf32>
    %33 = vector.shape_cast %32 : vector<1x16x34xf32> to vector<16x34xf32>
    %cst_19 = arith.constant dense<0.000000e+00> : vector<4x34xf32>
    %34 = tpu.matmul %31, %33, %cst_19 {dimension_numbers = #tpu.dot_dimension_numbers<[1], [0], [0], [1], [0, 0, 1, 1], [], []>} : vector<4x16xf32>, vector<16x34xf32>, vector<4x34xf32> -> vector<4x34xf32>
    %35 = arith.addf %28, %34 : vector<4x34xf32>
    %c1 = arith.constant 1 : index
    %c0_20 = arith.constant 0 : index
    %c0_21 = arith.constant 0 : index
    %36 = vector.load %arg4[%c1, %c0_20, %c0_21] : memref<3x4x4xf32, #tpu.memory_space<vmem>>, vector<1x4x4xf32>
    %37 = vector.shape_cast %36 : vector<1x4x4xf32> to vector<4x4xf32>
    %cst_22 = arith.constant dense<0.000000e+00> : vector<4x16xf32>
    %38 = tpu.matmul %37, %27, %cst_22 {dimension_numbers = #tpu.dot_dimension_numbers<[1], [0], [0], [1], [0, 0, 1, 1], [], []>} : vector<4x4xf32>, vector<4x16xf32>, vector<4x16xf32> -> vector<4x16xf32>
    %c1_23 = arith.constant 1 : index
    %c0_24 = arith.constant 0 : index
    %c0_25 = arith.constant 0 : index
    %39 = vector.load %arg5[%c1_23, %c0_24, %c0_25] : memref<3x16x34xf32, #tpu.memory_space<vmem>>, vector<1x16x34xf32>
    %40 = vector.shape_cast %39 : vector<1x16x34xf32> to vector<16x34xf32>
    %cst_26 = arith.constant dense<0.000000e+00> : vector<4x34xf32>
    %41 = tpu.matmul %38, %40, %cst_26 {dimension_numbers = #tpu.dot_dimension_numbers<[1], [0], [0], [1], [0, 0, 1, 1], [], []>} : vector<4x16xf32>, vector<16x34xf32>, vector<4x34xf32> -> vector<4x34xf32>
    %42 = arith.addf %35, %41 : vector<4x34xf32>
    %c2 = arith.constant 2 : index
    %c0_27 = arith.constant 0 : index
    %c0_28 = arith.constant 0 : index
    %43 = vector.load %arg4[%c2, %c0_27, %c0_28] : memref<3x4x4xf32, #tpu.memory_space<vmem>>, vector<1x4x4xf32>
    %44 = vector.shape_cast %43 : vector<1x4x4xf32> to vector<4x4xf32>
    %cst_29 = arith.constant dense<0.000000e+00> : vector<4x16xf32>
    %45 = tpu.matmul %44, %27, %cst_29 {dimension_numbers = #tpu.dot_dimension_numbers<[1], [0], [0], [1], [0, 0, 1, 1], [], []>} : vector<4x4xf32>, vector<4x16xf32>, vector<4x16xf32> -> vector<4x16xf32>
    %c2_30 = arith.constant 2 : index
    %c0_31 = arith.constant 0 : index
    %c0_32 = arith.constant 0 : index
    %46 = vector.load %arg5[%c2_30, %c0_31, %c0_32] : memref<3x16x34xf32, #tpu.memory_space<vmem>>, vector<1x16x34xf32>
    %47 = vector.shape_cast %46 : vector<1x16x34xf32> to vector<16x34xf32>
    %cst_33 = arith.constant dense<0.000000e+00> : vector<4x34xf32>
    %48 = tpu.matmul %45, %47, %cst_33 {dimension_numbers = #tpu.dot_dimension_numbers<[1], [0], [0], [1], [0, 0, 1, 1], [], []>} : vector<4x16xf32>, vector<16x34xf32>, vector<4x34xf32> -> vector<4x34xf32>
    %49 = arith.addf %42, %48 : vector<4x34xf32>
    %c0_34 = arith.constant 0 : index
    %c0_35 = arith.constant 0 : index
    %50 = vector.load %arg1[%c0_34, %c0_35] : memref<4x34xf32, #tpu.memory_space<vmem>>, vector<4x34xf32>
    %cst_36 = arith.constant dense<0.000000e+00> : vector<4xf32>
    %51 = vector.multi_reduction <add>, %49, %cst_36 [1] : vector<4x34xf32> to vector<4xf32>
    %52 = vector.shape_cast %51 : vector<4xf32> to vector<4x1xf32>
    %cst_37 = arith.constant 0.0294117648 : f32
    %53 = vector.broadcast %cst_37 : f32 to vector<4x1xf32>
    %54 = arith.mulf %52, %53 : vector<4x1xf32>
    %55 = vector.broadcast %54 : vector<4x1xf32> to vector<4x34xf32>
    %56 = arith.subf %49, %55 : vector<4x34xf32>
    %57 = arith.mulf %56, %56 : vector<4x34xf32>
    %cst_38 = arith.constant dense<0.000000e+00> : vector<4xf32>
    %58 = vector.multi_reduction <add>, %57, %cst_38 [1] : vector<4x34xf32> to vector<4xf32>
    %59 = vector.shape_cast %58 : vector<4xf32> to vector<4x1xf32>
    %cst_39 = arith.constant 0.0294117648 : f32
    %60 = vector.broadcast %cst_39 : f32 to vector<4x1xf32>
    %61 = arith.mulf %59, %60 : vector<4x1xf32>
    %cst_40 = arith.constant 9.99999974E-6 : f32
    %62 = vector.broadcast %cst_40 : f32 to vector<4x1xf32>
    %63 = arith.addf %61, %62 : vector<4x1xf32>
    %64 = math.rsqrt %63 : vector<4x1xf32>
    %65 = vector.broadcast %64 : vector<4x1xf32> to vector<4x34xf32>
    %66 = arith.mulf %56, %65 : vector<4x34xf32>
    %c0_41 = arith.constant 0 : index
    %c0_42 = arith.constant 0 : index
    %67 = vector.load %arg6[%c0_41, %c0_42] : memref<4x1xf32, #tpu.memory_space<vmem>>, vector<4x1xf32>
    %68 = vector.broadcast %67 : vector<4x1xf32> to vector<4x34xf32>
    %69 = arith.mulf %66, %68 : vector<4x34xf32>
    %c0_43 = arith.constant 0 : index
    %c0_44 = arith.constant 0 : index
    %70 = vector.load %arg7[%c0_43, %c0_44] : memref<4x1xf32, #tpu.memory_space<vmem>>, vector<4x1xf32>
    %71 = vector.broadcast %70 : vector<4x1xf32> to vector<4x34xf32>
    %72 = arith.addf %69, %71 : vector<4x34xf32>
    %cst_45 = arith.constant 0.000000e+00 : f32
    %73 = vector.broadcast %cst_45 : f32 to vector<4x34xf32>
    %74 = arith.cmpf oge, %72, %73 : vector<4x34xf32>
    %cst_46 = arith.constant 0.00999999977 : f32
    %75 = vector.broadcast %cst_46 : f32 to vector<4x34xf32>
    %76 = arith.mulf %75, %72 : vector<4x34xf32>
    %77 = arith.select %74, %72, %76 : vector<4x34xi1>, vector<4x34xf32>
    %cst_47 = arith.constant dense<0.000000e+00> : vector<4xf32>
    %78 = vector.multi_reduction <add>, %50, %cst_47 [1] : vector<4x34xf32> to vector<4xf32>
    %79 = vector.shape_cast %78 : vector<4xf32> to vector<4x1xf32>
    %cst_48 = arith.constant 0.0294117648 : f32
    %80 = vector.broadcast %cst_48 : f32 to vector<4x1xf32>
    %81 = arith.mulf %79, %80 : vector<4x1xf32>
    %82 = vector.broadcast %81 : vector<4x1xf32> to vector<4x34xf32>
    %83 = arith.subf %50, %82 : vector<4x34xf32>
    %84 = arith.mulf %83, %83 : vector<4x34xf32>
    %cst_49 = arith.constant dense<0.000000e+00> : vector<4xf32>
    %85 = vector.multi_reduction <add>, %84, %cst_49 [1] : vector<4x34xf32> to vector<4xf32>
    %86 = vector.shape_cast %85 : vector<4xf32> to vector<4x1xf32>
    %cst_50 = arith.constant 0.0294117648 : f32
    %87 = vector.broadcast %cst_50 : f32 to vector<4x1xf32>
    %88 = arith.mulf %86, %87 : vector<4x1xf32>
    %cst_51 = arith.constant 9.99999974E-6 : f32
    %89 = vector.broadcast %cst_51 : f32 to vector<4x1xf32>
    %90 = arith.addf %88, %89 : vector<4x1xf32>
    %91 = math.rsqrt %90 : vector<4x1xf32>
    %92 = vector.broadcast %91 : vector<4x1xf32> to vector<4x34xf32>
    %93 = arith.mulf %83, %92 : vector<4x34xf32>
    %c0_52 = arith.constant 0 : index
    %c0_53 = arith.constant 0 : index
    %94 = vector.load %arg8[%c0_52, %c0_53] : memref<4x1xf32, #tpu.memory_space<vmem>>, vector<4x1xf32>
    %95 = vector.broadcast %94 : vector<4x1xf32> to vector<4x34xf32>
    %96 = arith.mulf %93, %95 : vector<4x34xf32>
    %c0_54 = arith.constant 0 : index
    %c0_55 = arith.constant 0 : index
    %97 = vector.load %arg9[%c0_54, %c0_55] : memref<4x1xf32, #tpu.memory_space<vmem>>, vector<4x1xf32>
    %98 = vector.broadcast %97 : vector<4x1xf32> to vector<4x34xf32>
    %99 = arith.addf %96, %98 : vector<4x34xf32>
    %cst_56 = arith.constant 0.000000e+00 : f32
    %100 = vector.broadcast %cst_56 : f32 to vector<4x34xf32>
    %101 = arith.cmpf oge, %99, %100 : vector<4x34xf32>
    %cst_57 = arith.constant 0.00999999977 : f32
    %102 = vector.broadcast %cst_57 : f32 to vector<4x34xf32>
    %103 = arith.mulf %102, %99 : vector<4x34xf32>
    %104 = arith.select %101, %99, %103 : vector<4x34xi1>, vector<4x34xf32>
    %105 = vector.extract_strided_slice %77 {offsets = [0, 0], sizes = [4, 16], strides = [1, 1]} : vector<4x34xf32> to vector<4x16xf32>
    %c0_58 = arith.constant 0 : index
    %c1_59 = arith.constant 1 : index
    %106 = vector.load %arg35[%c0_58, %c1_59] : memref<24x34xf32, #tpu.memory_space<vmem>>, vector<4x16xf32>
    tpu.vector_store %arg35[%c0_58, %c1_59], %105 {strides = array<i32>} : memref<24x34xf32, #tpu.memory_space<vmem>>, vector<4x16xf32>,
    %cst_60 = arith.constant 0.000000e+00 : f32
    %107 = vector.broadcast %cst_60 : f32 to vector<4x1xf32>
    %c0_61 = arith.constant 0 : index
    %c0_62 = arith.constant 0 : index
    %108 = vector.load %arg35[%c0_61, %c0_62] : memref<24x34xf32, #tpu.memory_space<vmem>>, vector<4x1xf32>
    tpu.vector_store %arg35[%c0_61, %c0_62], %107 {strides = array<i32>} : memref<24x34xf32, #tpu.memory_space<vmem>>, vector<4x1xf32>,
    %109 = vector.extract_strided_slice %77 {offsets = [0, 17], sizes = [4, 16], strides = [1, 1]} : vector<4x34xf32> to vector<4x16xf32>
    %c0_63 = arith.constant 0 : index
    %c18 = arith.constant 18 : index
    %110 = vector.load %arg35[%c0_63, %c18] : memref<24x34xf32, #tpu.memory_space<vmem>>, vector<4x16xf32>
    tpu.vector_store %arg35[%c0_63, %c18], %109 {strides = array<i32>} : memref<24x34xf32, #tpu.memory_space<vmem>>, vector<4x16xf32>,
    %cst_64 = arith.constant 0.000000e+00 : f32
    %111 = vector.broadcast %cst_64 : f32 to vector<4x1xf32>
    %c0_65 = arith.constant 0 : index
    %c17 = arith.constant 17 : index
    %112 = vector.load %arg35[%c0_65, %c17] : memref<24x34xf32, #tpu.memory_space<vmem>>, vector<4x1xf32>
    tpu.vector_store %arg35[%c0_65, %c17], %111 {strides = array<i32>} : memref<24x34xf32, #tpu.memory_space<vmem>>, vector<4x1xf32>,
    %113 = vector.extract_strided_slice %104 {offsets = [0, 0], sizes = [4, 16], strides = [1, 1]} : vector<4x34xf32> to vector<4x16xf32>
    %c4 = arith.constant 4 : index
    %c1_66 = arith.constant 1 : index
    %114 = vector.load %arg35[%c4, %c1_66] : memref<24x34xf32, #tpu.memory_space<vmem>>, vector<4x16xf32>
    tpu.vector_store %arg35[%c4, %c1_66], %113 {strides = array<i32>} : memref<24x34xf32, #tpu.memory_space<vmem>>, vector<4x16xf32>,
    %cst_67 = arith.constant 0.000000e+00 : f32
    %115 = vector.broadcast %cst_67 : f32 to vector<4x1xf32>
    %c4_68 = arith.constant 4 : index
    %c0_69 = arith.constant 0 : index
    %116 = vector.load %arg35[%c4_68, %c0_69] : memref<24x34xf32, #tpu.memory_space<vmem>>, vector<4x1xf32>
    tpu.vector_store %arg35[%c4_68, %c0_69], %115 {strides = array<i32>} : memref<24x34xf32, #tpu.memory_space<vmem>>, vector<4x1xf32>,
    %117 = vector.extract_strided_slice %104 {offsets = [0, 17], sizes = [4, 16], strides = [1, 1]} : vector<4x34xf32> to vector<4x16xf32>
    %c4_70 = arith.constant 4 : index
    %c18_71 = arith.constant 18 : index
    %118 = vector.load %arg35[%c4_70, %c18_71] : memref<24x34xf32, #tpu.memory_space<vmem>>, vector<4x16xf32>
    tpu.vector_store %arg35[%c4_70, %c18_71], %117 {strides = array<i32>} : memref<24x34xf32, #tpu.memory_space<vmem>>, vector<4x16xf32>,
    %cst_72 = arith.constant 0.000000e+00 : f32
    %119 = vector.broadcast %cst_72 : f32 to vector<4x1xf32>
    %c4_73 = arith.constant 4 : index
    %c17_74 = arith.constant 17 : index
    %120 = vector.load %arg35[%c4_73, %c17_74] : memref<24x34xf32, #tpu.memory_space<vmem>>, vector<4x1xf32>
    tpu.vector_store %arg35[%c4_73, %c17_74], %119 {strides = array<i32>} : memref<24x34xf32, #tpu.memory_space<vmem>>, vector<4x1xf32>,
    %121 = vector.extract_strided_slice %77 {offsets = [0, 0], sizes = [4, 17], strides = [1, 1]} : vector<4x34xf32> to vector<4x17xf32>
    %c8 = arith.constant 8 : index
    %c0_75 = arith.constant 0 : index
    %122 = vector.load %arg35[%c8, %c0_75] : memref<24x34xf32, #tpu.memory_space<vmem>>, vector<4x17xf32>
    tpu.vector_store %arg35[%c8, %c0_75], %121 {strides = array<i32>} : memref<24x34xf32, #tpu.memory_space<vmem>>, vector<4x17xf32>,
    %123 = vector.extract_strided_slice %77 {offsets = [0, 17], sizes = [4, 17], strides = [1, 1]} : vector<4x34xf32> to vector<4x17xf32>
    %c8_76 = arith.constant 8 : index
    %c17_77 = arith.constant 17 : index
    %124 = vector.load %arg35[%c8_76, %c17_77] : memref<24x34xf32, #tpu.memory_space<vmem>>, vector<4x17xf32>
    tpu.vector_store %arg35[%c8_76, %c17_77], %123 {strides = array<i32>} : memref<24x34xf32, #tpu.memory_space<vmem>>, vector<4x17xf32>,
    %125 = vector.extract_strided_slice %104 {offsets = [0, 0], sizes = [4, 17], strides = [1, 1]} : vector<4x34xf32> to vector<4x17xf32>
    %c12 = arith.constant 12 : index
    %c0_78 = arith.constant 0 : index
    %126 = vector.load %arg35[%c12, %c0_78] : memref<24x34xf32, #tpu.memory_space<vmem>>, vector<4x17xf32>
    tpu.vector_store %arg35[%c12, %c0_78], %125 {strides = array<i32>} : memref<24x34xf32, #tpu.memory_space<vmem>>, vector<4x17xf32>,
    %127 = vector.extract_strided_slice %104 {offsets = [0, 17], sizes = [4, 17], strides = [1, 1]} : vector<4x34xf32> to vector<4x17xf32>
    %c12_79 = arith.constant 12 : index
    %c17_80 = arith.constant 17 : index
    %128 = vector.load %arg35[%c12_79, %c17_80] : memref<24x34xf32, #tpu.memory_space<vmem>>, vector<4x17xf32>
    tpu.vector_store %arg35[%c12_79, %c17_80], %127 {strides = array<i32>} : memref<24x34xf32, #tpu.memory_space<vmem>>, vector<4x17xf32>,
    %129 = vector.extract_strided_slice %77 {offsets = [0, 1], sizes = [4, 16], strides = [1, 1]} : vector<4x34xf32> to vector<4x16xf32>
    %c16 = arith.constant 16 : index
    %c0_81 = arith.constant 0 : index
    %130 = vector.load %arg35[%c16, %c0_81] : memref<24x34xf32, #tpu.memory_space<vmem>>, vector<4x16xf32>
    tpu.vector_store %arg35[%c16, %c0_81], %129 {strides = array<i32>} : memref<24x34xf32, #tpu.memory_space<vmem>>, vector<4x16xf32>,
    %cst_82 = arith.constant 0.000000e+00 : f32
    %131 = vector.broadcast %cst_82 : f32 to vector<4x1xf32>
    %c16_83 = arith.constant 16 : index
    %c16_84 = arith.constant 16 : index
    %132 = vector.load %arg35[%c16_83, %c16_84] : memref<24x34xf32, #tpu.memory_space<vmem>>, vector<4x1xf32>
    tpu.vector_store %arg35[%c16_83, %c16_84], %131 {strides = array<i32>} : memref<24x34xf32, #tpu.memory_space<vmem>>, vector<4x1xf32>,
    %133 = vector.extract_strided_slice %77 {offsets = [0, 18], sizes = [4, 16], strides = [1, 1]} : vector<4x34xf32> to vector<4x16xf32>
    %c16_85 = arith.constant 16 : index
    %c17_86 = arith.constant 17 : index
    %134 = vector.load %arg35[%c16_85, %c17_86] : memref<24x34xf32, #tpu.memory_space<vmem>>, vector<4x16xf32>
    tpu.vector_store %arg35[%c16_85, %c17_86], %133 {strides = array<i32>} : memref<24x34xf32, #tpu.memory_space<vmem>>, vector<4x16xf32>,
    %cst_87 = arith.constant 0.000000e+00 : f32
    %135 = vector.broadcast %cst_87 : f32 to vector<4x1xf32>
    %c16_88 = arith.constant 16 : index
    %c33 = arith.constant 33 : index
    %136 = vector.load %arg35[%c16_88, %c33] : memref<24x34xf32, #tpu.memory_space<vmem>>, vector<4x1xf32>
    tpu.vector_store %arg35[%c16_88, %c33], %135 {strides = array<i32>} : memref<24x34xf32, #tpu.memory_space<vmem>>, vector<4x1xf32>,
    %137 = vector.extract_strided_slice %104 {offsets = [0, 1], sizes = [4, 16], strides = [1, 1]} : vector<4x34xf32> to vector<4x16xf32>
    %c20 = arith.constant 20 : index
    %c0_89 = arith.constant 0 : index
    %138 = vector.load %arg35[%c20, %c0_89] : memref<24x34xf32, #tpu.memory_space<vmem>>, vector<4x16xf32>
    tpu.vector_store %arg35[%c20, %c0_89], %137 {strides = array<i32>} : memref<24x34xf32, #tpu.memory_space<vmem>>, vector<4x16xf32>,
    %cst_90 = arith.constant 0.000000e+00 : f32
    %139 = vector.broadcast %cst_90 : f32 to vector<4x1xf32>
    %c20_91 = arith.constant 20 : index
    %c16_92 = arith.constant 16 : index
    %140 = vector.load %arg35[%c20_91, %c16_92] : memref<24x34xf32, #tpu.memory_space<vmem>>, vector<4x1xf32>
    tpu.vector_store %arg35[%c20_91, %c16_92], %139 {strides = array<i32>} : memref<24x34xf32, #tpu.memory_space<vmem>>, vector<4x1xf32>,
    %141 = vector.extract_strided_slice %104 {offsets = [0, 18], sizes = [4, 16], strides = [1, 1]} : vector<4x34xf32> to vector<4x16xf32>
    %c20_93 = arith.constant 20 : index
    %c17_94 = arith.constant 17 : index
    %142 = vector.load %arg35[%c20_93, %c17_94] : memref<24x34xf32, #tpu.memory_space<vmem>>, vector<4x16xf32>
    tpu.vector_store %arg35[%c20_93, %c17_94], %141 {strides = array<i32>} : memref<24x34xf32, #tpu.memory_space<vmem>>, vector<4x16xf32>,
    %cst_95 = arith.constant 0.000000e+00 : f32
    %143 = vector.broadcast %cst_95 : f32 to vector<4x1xf32>
    %c20_96 = arith.constant 20 : index
    %c33_97 = arith.constant 33 : index
    %144 = vector.load %arg35[%c20_96, %c33_97] : memref<24x34xf32, #tpu.memory_space<vmem>>, vector<4x1xf32>
    tpu.vector_store %arg35[%c20_96, %c33_97], %143 {strides = array<i32>} : memref<24x34xf32, #tpu.memory_space<vmem>>, vector<4x1xf32>,
    %c0_98 = arith.constant 0 : index
    %c0_99 = arith.constant 0 : index
    %145 = vector.load %arg10[%c0_98, %c0_99] : memref<4x24xf32, #tpu.memory_space<vmem>>, vector<4x24xf32>
    %c0_100 = arith.constant 0 : index
    %c0_101 = arith.constant 0 : index
    %146 = vector.load %arg35[%c0_100, %c0_101] : memref<24x34xf32, #tpu.memory_space<vmem>>, vector<24x34xf32>
    %cst_102 = arith.constant dense<0.000000e+00> : vector<4x34xf32>
    %147 = tpu.matmul %145, %146, %cst_102 {dimension_numbers = #tpu.dot_dimension_numbers<[1], [0], [0], [1], [0, 0, 1, 1], [], []>} : vector<4x24xf32>, vector<24x34xf32>, vector<4x34xf32> -> vector<4x34xf32>
    %cst_103 = arith.constant dense<0.000000e+00> : vector<4xf32>
    %148 = vector.multi_reduction <add>, %147, %cst_103 [1] : vector<4x34xf32> to vector<4xf32>
    %149 = vector.shape_cast %148 : vector<4xf32> to vector<4x1xf32>
    %cst_104 = arith.constant 0.0294117648 : f32
    %150 = vector.broadcast %cst_104 : f32 to vector<4x1xf32>
    %151 = arith.mulf %149, %150 : vector<4x1xf32>
    %152 = vector.broadcast %151 : vector<4x1xf32> to vector<4x34xf32>
    %153 = arith.subf %147, %152 : vector<4x34xf32>
    %154 = arith.mulf %153, %153 : vector<4x34xf32>
    %cst_105 = arith.constant dense<0.000000e+00> : vector<4xf32>
    %155 = vector.multi_reduction <add>, %154, %cst_105 [1] : vector<4x34xf32> to vector<4xf32>
    %156 = vector.shape_cast %155 : vector<4xf32> to vector<4x1xf32>
    %cst_106 = arith.constant 0.0294117648 : f32
    %157 = vector.broadcast %cst_106 : f32 to vector<4x1xf32>
    %158 = arith.mulf %156, %157 : vector<4x1xf32>
    %cst_107 = arith.constant 9.99999974E-6 : f32
    %159 = vector.broadcast %cst_107 : f32 to vector<4x1xf32>
    %160 = arith.addf %158, %159 : vector<4x1xf32>
    %161 = math.rsqrt %160 : vector<4x1xf32>
    %162 = vector.broadcast %161 : vector<4x1xf32> to vector<4x34xf32>
    %163 = arith.mulf %153, %162 : vector<4x34xf32>
    %c0_108 = arith.constant 0 : index
    %c0_109 = arith.constant 0 : index
    %164 = vector.load %arg11[%c0_108, %c0_109] : memref<4x1xf32, #tpu.memory_space<vmem>>, vector<4x1xf32>
    %165 = vector.broadcast %164 : vector<4x1xf32> to vector<4x34xf32>
    %166 = arith.mulf %163, %165 : vector<4x34xf32>
    %c0_110 = arith.constant 0 : index
    %c0_111 = arith.constant 0 : index
    %167 = vector.load %arg12[%c0_110, %c0_111] : memref<4x1xf32, #tpu.memory_space<vmem>>, vector<4x1xf32>
    %168 = vector.broadcast %167 : vector<4x1xf32> to vector<4x34xf32>
    %169 = arith.addf %166, %168 : vector<4x34xf32>
    %cst_112 = arith.constant 0.000000e+00 : f32
    %170 = vector.broadcast %cst_112 : f32 to vector<4x34xf32>
    %171 = arith.cmpf oge, %169, %170 : vector<4x34xf32>
    %cst_113 = arith.constant 0.00999999977 : f32
    %172 = vector.broadcast %cst_113 : f32 to vector<4x34xf32>
    %173 = arith.mulf %172, %169 : vector<4x34xf32>
    %174 = arith.select %171, %169, %173 : vector<4x34xi1>, vector<4x34xf32>
    %175 = vector.extract_strided_slice %174 {offsets = [0, 0], sizes = [4, 16], strides = [1, 1]} : vector<4x34xf32> to vector<4x16xf32>
    %c0_114 = arith.constant 0 : index
    %c1_115 = arith.constant 1 : index
    %176 = vector.load %arg35[%c0_114, %c1_115] : memref<24x34xf32, #tpu.memory_space<vmem>>, vector<4x16xf32>
    tpu.vector_store %arg35[%c0_114, %c1_115], %175 {strides = array<i32>} : memref<24x34xf32, #tpu.memory_space<vmem>>, vector<4x16xf32>,
    %cst_116 = arith.constant 0.000000e+00 : f32
    %177 = vector.broadcast %cst_116 : f32 to vector<4x1xf32>
    %c0_117 = arith.constant 0 : index
    %c0_118 = arith.constant 0 : index
    %178 = vector.load %arg35[%c0_117, %c0_118] : memref<24x34xf32, #tpu.memory_space<vmem>>, vector<4x1xf32>
    tpu.vector_store %arg35[%c0_117, %c0_118], %177 {strides = array<i32>} : memref<24x34xf32, #tpu.memory_space<vmem>>, vector<4x1xf32>,
    %179 = vector.extract_strided_slice %174 {offsets = [0, 17], sizes = [4, 16], strides = [1, 1]} : vector<4x34xf32> to vector<4x16xf32>
    %c0_119 = arith.constant 0 : index
    %c18_120 = arith.constant 18 : index
    %180 = vector.load %arg35[%c0_119, %c18_120] : memref<24x34xf32, #tpu.memory_space<vmem>>, vector<4x16xf32>
    tpu.vector_store %arg35[%c0_119, %c18_120], %179 {strides = array<i32>} : memref<24x34xf32, #tpu.memory_space<vmem>>, vector<4x16xf32>,
    %cst_121 = arith.constant 0.000000e+00 : f32
    %181 = vector.broadcast %cst_121 : f32 to vector<4x1xf32>
    %c0_122 = arith.constant 0 : index
    %c17_123 = arith.constant 17 : index
    %182 = vector.load %arg35[%c0_122, %c17_123] : memref<24x34xf32, #tpu.memory_space<vmem>>, vector<4x1xf32>
    tpu.vector_store %arg35[%c0_122, %c17_123], %181 {strides = array<i32>} : memref<24x34xf32, #tpu.memory_space<vmem>>, vector<4x1xf32>,
    %183 = vector.extract_strided_slice %174 {offsets = [0, 0], sizes = [4, 17], strides = [1, 1]} : vector<4x34xf32> to vector<4x17xf32>
    %c4_124 = arith.constant 4 : index
    %c0_125 = arith.constant 0 : index
    %184 = vector.load %arg35[%c4_124, %c0_125] : memref<24x34xf32, #tpu.memory_space<vmem>>, vector<4x17xf32>
    tpu.vector_store %arg35[%c4_124, %c0_125], %183 {strides = array<i32>} : memref<24x34xf32, #tpu.memory_space<vmem>>, vector<4x17xf32>,
    %185 = vector.extract_strided_slice %174 {offsets = [0, 17], sizes = [4, 17], strides = [1, 1]} : vector<4x34xf32> to vector<4x17xf32>
    %c4_126 = arith.constant 4 : index
    %c17_127 = arith.constant 17 : index
    %186 = vector.load %arg35[%c4_126, %c17_127] : memref<24x34xf32, #tpu.memory_space<vmem>>, vector<4x17xf32>
    tpu.vector_store %arg35[%c4_126, %c17_127], %185 {strides = array<i32>} : memref<24x34xf32, #tpu.memory_space<vmem>>, vector<4x17xf32>,
    %187 = vector.extract_strided_slice %174 {offsets = [0, 1], sizes = [4, 16], strides = [1, 1]} : vector<4x34xf32> to vector<4x16xf32>
    %c8_128 = arith.constant 8 : index
    %c0_129 = arith.constant 0 : index
    %188 = vector.load %arg35[%c8_128, %c0_129] : memref<24x34xf32, #tpu.memory_space<vmem>>, vector<4x16xf32>
    tpu.vector_store %arg35[%c8_128, %c0_129], %187 {strides = array<i32>} : memref<24x34xf32, #tpu.memory_space<vmem>>, vector<4x16xf32>,
    %cst_130 = arith.constant 0.000000e+00 : f32
    %189 = vector.broadcast %cst_130 : f32 to vector<4x1xf32>
    %c8_131 = arith.constant 8 : index
    %c16_132 = arith.constant 16 : index
    %190 = vector.load %arg35[%c8_131, %c16_132] : memref<24x34xf32, #tpu.memory_space<vmem>>, vector<4x1xf32>
    tpu.vector_store %arg35[%c8_131, %c16_132], %189 {strides = array<i32>} : memref<24x34xf32, #tpu.memory_space<vmem>>, vector<4x1xf32>,
    %191 = vector.extract_strided_slice %174 {offsets = [0, 18], sizes = [4, 16], strides = [1, 1]} : vector<4x34xf32> to vector<4x16xf32>
    %c8_133 = arith.constant 8 : index
    %c17_134 = arith.constant 17 : index
    %192 = vector.load %arg35[%c8_133, %c17_134] : memref<24x34xf32, #tpu.memory_space<vmem>>, vector<4x16xf32>
    tpu.vector_store %arg35[%c8_133, %c17_134], %191 {strides = array<i32>} : memref<24x34xf32, #tpu.memory_space<vmem>>, vector<4x16xf32>,
    %cst_135 = arith.constant 0.000000e+00 : f32
    %193 = vector.broadcast %cst_135 : f32 to vector<4x1xf32>
    %c8_136 = arith.constant 8 : index
    %c33_137 = arith.constant 33 : index
    %194 = vector.load %arg35[%c8_136, %c33_137] : memref<24x34xf32, #tpu.memory_space<vmem>>, vector<4x1xf32>
    tpu.vector_store %arg35[%c8_136, %c33_137], %193 {strides = array<i32>} : memref<24x34xf32, #tpu.memory_space<vmem>>, vector<4x1xf32>,
    %c0_138 = arith.constant 0 : index
    %c0_139 = arith.constant 0 : index
    %195 = vector.load %arg13[%c0_138, %c0_139] : memref<4x12xf32, #tpu.memory_space<vmem>>, vector<4x12xf32>
    %c0_140 = arith.constant 0 : index
    %c0_141 = arith.constant 0 : index
    %196 = vector.load %arg35[%c0_140, %c0_141] : memref<24x34xf32, #tpu.memory_space<vmem>>, vector<12x34xf32>
    %cst_142 = arith.constant dense<0.000000e+00> : vector<4x34xf32>
    %197 = tpu.matmul %195, %196, %cst_142 {dimension_numbers = #tpu.dot_dimension_numbers<[1], [0], [0], [1], [0, 0, 1, 1], [], []>} : vector<4x12xf32>, vector<12x34xf32>, vector<4x34xf32> -> vector<4x34xf32>
    %c0_143 = arith.constant 0 : index
    %c0_144 = arith.constant 0 : index
    %198 = vector.load %arg14[%c0_143, %c0_144] : memref<4x8xf32, #tpu.memory_space<vmem>>, vector<4x8xf32>
    %c0_145 = arith.constant 0 : index
    %c0_146 = arith.constant 0 : index
    %199 = vector.load %arg15[%c0_145, %c0_146] : memref<4x1xf32, #tpu.memory_space<vmem>>, vector<4x1xf32>
    %200 = vector.extract_strided_slice %198 {offsets = [0, 0], sizes = [4, 4], strides = [1, 1]} : vector<4x8xf32> to vector<4x4xf32>
    %cst_147 = arith.constant dense<0.000000e+00> : vector<4x34xf32>
    %201 = tpu.matmul %200, %49, %cst_147 {dimension_numbers = #tpu.dot_dimension_numbers<[1], [0], [0], [1], [0, 0, 1, 1], [], []>} : vector<4x4xf32>, vector<4x34xf32>, vector<4x34xf32> -> vector<4x34xf32>
    %202 = vector.broadcast %199 : vector<4x1xf32> to vector<4x34xf32>
    %203 = arith.addf %202, %201 : vector<4x34xf32>
    %204 = vector.extract_strided_slice %198 {offsets = [0, 4], sizes = [4, 4], strides = [1, 1]} : vector<4x8xf32> to vector<4x4xf32>
    %cst_148 = arith.constant dense<0.000000e+00> : vector<4x34xf32>
    %205 = tpu.matmul %204, %50, %cst_148 {dimension_numbers = #tpu.dot_dimension_numbers<[1], [0], [0], [1], [0, 0, 1, 1], [], []>} : vector<4x4xf32>, vector<4x34xf32>, vector<4x34xf32> -> vector<4x34xf32>
    %206 = arith.addf %203, %205 : vector<4x34xf32>
    %207 = arith.addf %197, %206 : vector<4x34xf32>
    %cst_149 = arith.constant dense<0.000000e+00> : vector<4xf32>
    %208 = vector.multi_reduction <add>, %207, %cst_149 [1] : vector<4x34xf32> to vector<4xf32>
    %209 = vector.shape_cast %208 : vector<4xf32> to vector<4x1xf32>
    %cst_150 = arith.constant 0.0294117648 : f32
    %210 = vector.broadcast %cst_150 : f32 to vector<4x1xf32>
    %211 = arith.mulf %209, %210 : vector<4x1xf32>
    %212 = vector.broadcast %211 : vector<4x1xf32> to vector<4x34xf32>
    %213 = arith.subf %207, %212 : vector<4x34xf32>
    %214 = arith.mulf %213, %213 : vector<4x34xf32>
    %cst_151 = arith.constant dense<0.000000e+00> : vector<4xf32>
    %215 = vector.multi_reduction <add>, %214, %cst_151 [1] : vector<4x34xf32> to vector<4xf32>
    %216 = vector.shape_cast %215 : vector<4xf32> to vector<4x1xf32>
    %cst_152 = arith.constant 0.0294117648 : f32
    %217 = vector.broadcast %cst_152 : f32 to vector<4x1xf32>
    %218 = arith.mulf %216, %217 : vector<4x1xf32>
    %cst_153 = arith.constant 9.99999974E-6 : f32
    %219 = vector.broadcast %cst_153 : f32 to vector<4x1xf32>
    %220 = arith.addf %218, %219 : vector<4x1xf32>
    %221 = math.rsqrt %220 : vector<4x1xf32>
    %222 = vector.broadcast %221 : vector<4x1xf32> to vector<4x34xf32>
    %223 = arith.mulf %213, %222 : vector<4x34xf32>
    %c0_154 = arith.constant 0 : index
    %c0_155 = arith.constant 0 : index
    %224 = vector.load %arg16[%c0_154, %c0_155] : memref<4x1xf32, #tpu.memory_space<vmem>>, vector<4x1xf32>
    %225 = vector.broadcast %224 : vector<4x1xf32> to vector<4x34xf32>
    %226 = arith.mulf %223, %225 : vector<4x34xf32>
    %c0_156 = arith.constant 0 : index
    %c0_157 = arith.constant 0 : index
    %227 = vector.load %arg17[%c0_156, %c0_157] : memref<4x1xf32, #tpu.memory_space<vmem>>, vector<4x1xf32>
    %228 = vector.broadcast %227 : vector<4x1xf32> to vector<4x34xf32>
    %229 = arith.addf %226, %228 : vector<4x34xf32>
    %cst_158 = arith.constant 0.000000e+00 : f32
    %230 = vector.broadcast %cst_158 : f32 to vector<4x34xf32>
    %231 = arith.cmpf oge, %229, %230 : vector<4x34xf32>
    %cst_159 = arith.constant 0.00999999977 : f32
    %232 = vector.broadcast %cst_159 : f32 to vector<4x34xf32>
    %233 = arith.mulf %232, %229 : vector<4x34xf32>
    %234 = arith.select %231, %229, %233 : vector<4x34xi1>, vector<4x34xf32>
    %235 = vector.extract_strided_slice %234 {offsets = [0, 0], sizes = [4, 16], strides = [1, 1]} : vector<4x34xf32> to vector<4x16xf32>
    %c0_160 = arith.constant 0 : index
    %c1_161 = arith.constant 1 : index
    %236 = vector.load %arg35[%c0_160, %c1_161] : memref<24x34xf32, #tpu.memory_space<vmem>>, vector<4x16xf32>
    tpu.vector_store %arg35[%c0_160, %c1_161], %235 {strides = array<i32>} : memref<24x34xf32, #tpu.memory_space<vmem>>, vector<4x16xf32>,
    %cst_162 = arith.constant 0.000000e+00 : f32
    %237 = vector.broadcast %cst_162 : f32 to vector<4x1xf32>
    %c0_163 = arith.constant 0 : index
    %c0_164 = arith.constant 0 : index
    %238 = vector.load %arg35[%c0_163, %c0_164] : memref<24x34xf32, #tpu.memory_space<vmem>>, vector<4x1xf32>
    tpu.vector_store %arg35[%c0_163, %c0_164], %237 {strides = array<i32>} : memref<24x34xf32, #tpu.memory_space<vmem>>, vector<4x1xf32>,
    %239 = vector.extract_strided_slice %234 {offsets = [0, 17], sizes = [4, 16], strides = [1, 1]} : vector<4x34xf32> to vector<4x16xf32>
    %c0_165 = arith.constant 0 : index
    %c18_166 = arith.constant 18 : index
    %240 = vector.load %arg35[%c0_165, %c18_166] : memref<24x34xf32, #tpu.memory_space<vmem>>, vector<4x16xf32>
    tpu.vector_store %arg35[%c0_165, %c18_166], %239 {strides = array<i32>} : memref<24x34xf32, #tpu.memory_space<vmem>>, vector<4x16xf32>,
    %cst_167 = arith.constant 0.000000e+00 : f32
    %241 = vector.broadcast %cst_167 : f32 to vector<4x1xf32>
    %c0_168 = arith.constant 0 : index
    %c17_169 = arith.constant 17 : index
    %242 = vector.load %arg35[%c0_168, %c17_169] : memref<24x34xf32, #tpu.memory_space<vmem>>, vector<4x1xf32>
    tpu.vector_store %arg35[%c0_168, %c17_169], %241 {strides = array<i32>} : memref<24x34xf32, #tpu.memory_space<vmem>>, vector<4x1xf32>,
    %243 = vector.extract_strided_slice %234 {offsets = [0, 0], sizes = [4, 17], strides = [1, 1]} : vector<4x34xf32> to vector<4x17xf32>
    %c4_170 = arith.constant 4 : index
    %c0_171 = arith.constant 0 : index
    %244 = vector.load %arg35[%c4_170, %c0_171] : memref<24x34xf32, #tpu.memory_space<vmem>>, vector<4x17xf32>
    tpu.vector_store %arg35[%c4_170, %c0_171], %243 {strides = array<i32>} : memref<24x34xf32, #tpu.memory_space<vmem>>, vector<4x17xf32>,
    %245 = vector.extract_strided_slice %234 {offsets = [0, 17], sizes = [4, 17], strides = [1, 1]} : vector<4x34xf32> to vector<4x17xf32>
    %c4_172 = arith.constant 4 : index
    %c17_173 = arith.constant 17 : index
    %246 = vector.load %arg35[%c4_172, %c17_173] : memref<24x34xf32, #tpu.memory_space<vmem>>, vector<4x17xf32>
    tpu.vector_store %arg35[%c4_172, %c17_173], %245 {strides = array<i32>} : memref<24x34xf32, #tpu.memory_space<vmem>>, vector<4x17xf32>,
    %247 = vector.extract_strided_slice %234 {offsets = [0, 1], sizes = [4, 16], strides = [1, 1]} : vector<4x34xf32> to vector<4x16xf32>
    %c8_174 = arith.constant 8 : index
    %c0_175 = arith.constant 0 : index
    %248 = vector.load %arg35[%c8_174, %c0_175] : memref<24x34xf32, #tpu.memory_space<vmem>>, vector<4x16xf32>
    tpu.vector_store %arg35[%c8_174, %c0_175], %247 {strides = array<i32>} : memref<24x34xf32, #tpu.memory_space<vmem>>, vector<4x16xf32>,
    %cst_176 = arith.constant 0.000000e+00 : f32
    %249 = vector.broadcast %cst_176 : f32 to vector<4x1xf32>
    %c8_177 = arith.constant 8 : index
    %c16_178 = arith.constant 16 : index
    %250 = vector.load %arg35[%c8_177, %c16_178] : memref<24x34xf32, #tpu.memory_space<vmem>>, vector<4x1xf32>
    tpu.vector_store %arg35[%c8_177, %c16_178], %249 {strides = array<i32>} : memref<24x34xf32, #tpu.memory_space<vmem>>, vector<4x1xf32>,
    %251 = vector.extract_strided_slice %234 {offsets = [0, 18], sizes = [4, 16], strides = [1, 1]} : vector<4x34xf32> to vector<4x16xf32>
    %c8_179 = arith.constant 8 : index
    %c17_180 = arith.constant 17 : index
    %252 = vector.load %arg35[%c8_179, %c17_180] : memref<24x34xf32, #tpu.memory_space<vmem>>, vector<4x16xf32>
    tpu.vector_store %arg35[%c8_179, %c17_180], %251 {strides = array<i32>} : memref<24x34xf32, #tpu.memory_space<vmem>>, vector<4x16xf32>,
    %cst_181 = arith.constant 0.000000e+00 : f32
    %253 = vector.broadcast %cst_181 : f32 to vector<4x1xf32>
    %c8_182 = arith.constant 8 : index
    %c33_183 = arith.constant 33 : index
    %254 = vector.load %arg35[%c8_182, %c33_183] : memref<24x34xf32, #tpu.memory_space<vmem>>, vector<4x1xf32>
    tpu.vector_store %arg35[%c8_182, %c33_183], %253 {strides = array<i32>} : memref<24x34xf32, #tpu.memory_space<vmem>>, vector<4x1xf32>,
    %c0_184 = arith.constant 0 : index
    %c0_185 = arith.constant 0 : index
    %255 = vector.load %arg18[%c0_184, %c0_185] : memref<4x12xf32, #tpu.memory_space<vmem>>, vector<4x12xf32>
    %c0_186 = arith.constant 0 : index
    %c0_187 = arith.constant 0 : index
    %256 = vector.load %arg35[%c0_186, %c0_187] : memref<24x34xf32, #tpu.memory_space<vmem>>, vector<12x34xf32>
    %cst_188 = arith.constant dense<0.000000e+00> : vector<4x34xf32>
    %257 = tpu.matmul %255, %256, %cst_188 {dimension_numbers = #tpu.dot_dimension_numbers<[1], [0], [0], [1], [0, 0, 1, 1], [], []>} : vector<4x12xf32>, vector<12x34xf32>, vector<4x34xf32> -> vector<4x34xf32>
    %cst_189 = arith.constant dense<0.000000e+00> : vector<4xf32>
    %258 = vector.multi_reduction <add>, %257, %cst_189 [1] : vector<4x34xf32> to vector<4xf32>
    %259 = vector.shape_cast %258 : vector<4xf32> to vector<4x1xf32>
    %cst_190 = arith.constant 0.0294117648 : f32
    %260 = vector.broadcast %cst_190 : f32 to vector<4x1xf32>
    %261 = arith.mulf %259, %260 : vector<4x1xf32>
    %262 = vector.broadcast %261 : vector<4x1xf32> to vector<4x34xf32>
    %263 = arith.subf %257, %262 : vector<4x34xf32>
    %264 = arith.mulf %263, %263 : vector<4x34xf32>
    %cst_191 = arith.constant dense<0.000000e+00> : vector<4xf32>
    %265 = vector.multi_reduction <add>, %264, %cst_191 [1] : vector<4x34xf32> to vector<4xf32>
    %266 = vector.shape_cast %265 : vector<4xf32> to vector<4x1xf32>
    %cst_192 = arith.constant 0.0294117648 : f32
    %267 = vector.broadcast %cst_192 : f32 to vector<4x1xf32>
    %268 = arith.mulf %266, %267 : vector<4x1xf32>
    %cst_193 = arith.constant 9.99999974E-6 : f32
    %269 = vector.broadcast %cst_193 : f32 to vector<4x1xf32>
    %270 = arith.addf %268, %269 : vector<4x1xf32>
    %271 = math.rsqrt %270 : vector<4x1xf32>
    %272 = vector.broadcast %271 : vector<4x1xf32> to vector<4x34xf32>
    %273 = arith.mulf %263, %272 : vector<4x34xf32>
    %c0_194 = arith.constant 0 : index
    %c0_195 = arith.constant 0 : index
    %274 = vector.load %arg19[%c0_194, %c0_195] : memref<4x1xf32, #tpu.memory_space<vmem>>, vector<4x1xf32>
    %275 = vector.broadcast %274 : vector<4x1xf32> to vector<4x34xf32>
    %276 = arith.mulf %273, %275 : vector<4x34xf32>
    %c0_196 = arith.constant 0 : index
    %c0_197 = arith.constant 0 : index
    %277 = vector.load %arg20[%c0_196, %c0_197] : memref<4x1xf32, #tpu.memory_space<vmem>>, vector<4x1xf32>
    %278 = vector.broadcast %277 : vector<4x1xf32> to vector<4x34xf32>
    %279 = arith.addf %276, %278 : vector<4x34xf32>
    %cst_198 = arith.constant 0.000000e+00 : f32
    %280 = vector.broadcast %cst_198 : f32 to vector<4x34xf32>
    %281 = arith.cmpf oge, %279, %280 : vector<4x34xf32>
    %cst_199 = arith.constant 0.00999999977 : f32
    %282 = vector.broadcast %cst_199 : f32 to vector<4x34xf32>
    %283 = arith.mulf %282, %279 : vector<4x34xf32>
    %284 = arith.select %281, %279, %283 : vector<4x34xi1>, vector<4x34xf32>
    %285 = vector.extract_strided_slice %284 {offsets = [0, 0], sizes = [4, 16], strides = [1, 1]} : vector<4x34xf32> to vector<4x16xf32>
    %c0_200 = arith.constant 0 : index
    %c1_201 = arith.constant 1 : index
    %286 = vector.load %arg35[%c0_200, %c1_201] : memref<24x34xf32, #tpu.memory_space<vmem>>, vector<4x16xf32>
    tpu.vector_store %arg35[%c0_200, %c1_201], %285 {strides = array<i32>} : memref<24x34xf32, #tpu.memory_space<vmem>>, vector<4x16xf32>,
    %cst_202 = arith.constant 0.000000e+00 : f32
    %287 = vector.broadcast %cst_202 : f32 to vector<4x1xf32>
    %c0_203 = arith.constant 0 : index
    %c0_204 = arith.constant 0 : index
    %288 = vector.load %arg35[%c0_203, %c0_204] : memref<24x34xf32, #tpu.memory_space<vmem>>, vector<4x1xf32>
    tpu.vector_store %arg35[%c0_203, %c0_204], %287 {strides = array<i32>} : memref<24x34xf32, #tpu.memory_space<vmem>>, vector<4x1xf32>,
    %289 = vector.extract_strided_slice %284 {offsets = [0, 17], sizes = [4, 16], strides = [1, 1]} : vector<4x34xf32> to vector<4x16xf32>
    %c0_205 = arith.constant 0 : index
    %c18_206 = arith.constant 18 : index
    %290 = vector.load %arg35[%c0_205, %c18_206] : memref<24x34xf32, #tpu.memory_space<vmem>>, vector<4x16xf32>
    tpu.vector_store %arg35[%c0_205, %c18_206], %289 {strides = array<i32>} : memref<24x34xf32, #tpu.memory_space<vmem>>, vector<4x16xf32>,
    %cst_207 = arith.constant 0.000000e+00 : f32
    %291 = vector.broadcast %cst_207 : f32 to vector<4x1xf32>
    %c0_208 = arith.constant 0 : index
    %c17_209 = arith.constant 17 : index
    %292 = vector.load %arg35[%c0_208, %c17_209] : memref<24x34xf32, #tpu.memory_space<vmem>>, vector<4x1xf32>
    tpu.vector_store %arg35[%c0_208, %c17_209], %291 {strides = array<i32>} : memref<24x34xf32, #tpu.memory_space<vmem>>, vector<4x1xf32>,
    %293 = vector.extract_strided_slice %284 {offsets = [0, 0], sizes = [4, 17], strides = [1, 1]} : vector<4x34xf32> to vector<4x17xf32>
    %c4_210 = arith.constant 4 : index
    %c0_211 = arith.constant 0 : index
    %294 = vector.load %arg35[%c4_210, %c0_211] : memref<24x34xf32, #tpu.memory_space<vmem>>, vector<4x17xf32>
    tpu.vector_store %arg35[%c4_210, %c0_211], %293 {strides = array<i32>} : memref<24x34xf32, #tpu.memory_space<vmem>>, vector<4x17xf32>,
    %295 = vector.extract_strided_slice %284 {offsets = [0, 17], sizes = [4, 17], strides = [1, 1]} : vector<4x34xf32> to vector<4x17xf32>
    %c4_212 = arith.constant 4 : index
    %c17_213 = arith.constant 17 : index
    %296 = vector.load %arg35[%c4_212, %c17_213] : memref<24x34xf32, #tpu.memory_space<vmem>>, vector<4x17xf32>
    tpu.vector_store %arg35[%c4_212, %c17_213], %295 {strides = array<i32>} : memref<24x34xf32, #tpu.memory_space<vmem>>, vector<4x17xf32>,
    %297 = vector.extract_strided_slice %284 {offsets = [0, 1], sizes = [4, 16], strides = [1, 1]} : vector<4x34xf32> to vector<4x16xf32>
    %c8_214 = arith.constant 8 : index
    %c0_215 = arith.constant 0 : index
    %298 = vector.load %arg35[%c8_214, %c0_215] : memref<24x34xf32, #tpu.memory_space<vmem>>, vector<4x16xf32>
    tpu.vector_store %arg35[%c8_214, %c0_215], %297 {strides = array<i32>} : memref<24x34xf32, #tpu.memory_space<vmem>>, vector<4x16xf32>,
    %cst_216 = arith.constant 0.000000e+00 : f32
    %299 = vector.broadcast %cst_216 : f32 to vector<4x1xf32>
    %c8_217 = arith.constant 8 : index
    %c16_218 = arith.constant 16 : index
    %300 = vector.load %arg35[%c8_217, %c16_218] : memref<24x34xf32, #tpu.memory_space<vmem>>, vector<4x1xf32>
    tpu.vector_store %arg35[%c8_217, %c16_218], %299 {strides = array<i32>} : memref<24x34xf32, #tpu.memory_space<vmem>>, vector<4x1xf32>,
    %301 = vector.extract_strided_slice %284 {offsets = [0, 18], sizes = [4, 16], strides = [1, 1]} : vector<4x34xf32> to vector<4x16xf32>
    %c8_219 = arith.constant 8 : index
    %c17_220 = arith.constant 17 : index
    %302 = vector.load %arg35[%c8_219, %c17_220] : memref<24x34xf32, #tpu.memory_space<vmem>>, vector<4x16xf32>
    tpu.vector_store %arg35[%c8_219, %c17_220], %301 {strides = array<i32>} : memref<24x34xf32, #tpu.memory_space<vmem>>, vector<4x16xf32>,
    %cst_221 = arith.constant 0.000000e+00 : f32
    %303 = vector.broadcast %cst_221 : f32 to vector<4x1xf32>
    %c8_222 = arith.constant 8 : index
    %c33_223 = arith.constant 33 : index
    %304 = vector.load %arg35[%c8_222, %c33_223] : memref<24x34xf32, #tpu.memory_space<vmem>>, vector<4x1xf32>
    tpu.vector_store %arg35[%c8_222, %c33_223], %303 {strides = array<i32>} : memref<24x34xf32, #tpu.memory_space<vmem>>, vector<4x1xf32>,
    %c0_224 = arith.constant 0 : index
    %c0_225 = arith.constant 0 : index
    %305 = vector.load %arg21[%c0_224, %c0_225] : memref<4x12xf32, #tpu.memory_space<vmem>>, vector<4x12xf32>
    %c0_226 = arith.constant 0 : index
    %c0_227 = arith.constant 0 : index
    %306 = vector.load %arg35[%c0_226, %c0_227] : memref<24x34xf32, #tpu.memory_space<vmem>>, vector<12x34xf32>
    %cst_228 = arith.constant dense<0.000000e+00> : vector<4x34xf32>
    %307 = tpu.matmul %305, %306, %cst_228 {dimension_numbers = #tpu.dot_dimension_numbers<[1], [0], [0], [1], [0, 0, 1, 1], [], []>} : vector<4x12xf32>, vector<12x34xf32>, vector<4x34xf32> -> vector<4x34xf32>
    %308 = arith.addf %307, %207 : vector<4x34xf32>
    %cst_229 = arith.constant dense<0.000000e+00> : vector<4xf32>
    %309 = vector.multi_reduction <add>, %308, %cst_229 [1] : vector<4x34xf32> to vector<4xf32>
    %310 = vector.shape_cast %309 : vector<4xf32> to vector<4x1xf32>
    %cst_230 = arith.constant 0.0294117648 : f32
    %311 = vector.broadcast %cst_230 : f32 to vector<4x1xf32>
    %312 = arith.mulf %310, %311 : vector<4x1xf32>
    %313 = vector.broadcast %312 : vector<4x1xf32> to vector<4x34xf32>
    %314 = arith.subf %308, %313 : vector<4x34xf32>
    %315 = arith.mulf %314, %314 : vector<4x34xf32>
    %cst_231 = arith.constant dense<0.000000e+00> : vector<4xf32>
    %316 = vector.multi_reduction <add>, %315, %cst_231 [1] : vector<4x34xf32> to vector<4xf32>
    %317 = vector.shape_cast %316 : vector<4xf32> to vector<4x1xf32>
    %cst_232 = arith.constant 0.0294117648 : f32
    %318 = vector.broadcast %cst_232 : f32 to vector<4x1xf32>
    %319 = arith.mulf %317, %318 : vector<4x1xf32>
    %cst_233 = arith.constant 9.99999974E-6 : f32
    %320 = vector.broadcast %cst_233 : f32 to vector<4x1xf32>
    %321 = arith.addf %319, %320 : vector<4x1xf32>
    %322 = math.rsqrt %321 : vector<4x1xf32>
    %323 = vector.broadcast %322 : vector<4x1xf32> to vector<4x34xf32>
    %324 = arith.mulf %314, %323 : vector<4x34xf32>
    %c0_234 = arith.constant 0 : index
    %c0_235 = arith.constant 0 : index
    %325 = vector.load %arg22[%c0_234, %c0_235] : memref<4x1xf32, #tpu.memory_space<vmem>>, vector<4x1xf32>
    %326 = vector.broadcast %325 : vector<4x1xf32> to vector<4x34xf32>
    %327 = arith.mulf %324, %326 : vector<4x34xf32>
    %c0_236 = arith.constant 0 : index
    %c0_237 = arith.constant 0 : index
    %328 = vector.load %arg23[%c0_236, %c0_237] : memref<4x1xf32, #tpu.memory_space<vmem>>, vector<4x1xf32>
    %329 = vector.broadcast %328 : vector<4x1xf32> to vector<4x34xf32>
    %330 = arith.addf %327, %329 : vector<4x34xf32>
    %cst_238 = arith.constant 0.000000e+00 : f32
    %331 = vector.broadcast %cst_238 : f32 to vector<4x34xf32>
    %332 = arith.cmpf oge, %330, %331 : vector<4x34xf32>
    %cst_239 = arith.constant 0.00999999977 : f32
    %333 = vector.broadcast %cst_239 : f32 to vector<4x34xf32>
    %334 = arith.mulf %333, %330 : vector<4x34xf32>
    %335 = arith.select %332, %330, %334 : vector<4x34xi1>, vector<4x34xf32>
    %336 = vector.extract_strided_slice %335 {offsets = [0, 0], sizes = [4, 16], strides = [1, 1]} : vector<4x34xf32> to vector<4x16xf32>
    %c0_240 = arith.constant 0 : index
    %c1_241 = arith.constant 1 : index
    %337 = vector.load %arg35[%c0_240, %c1_241] : memref<24x34xf32, #tpu.memory_space<vmem>>, vector<4x16xf32>
    tpu.vector_store %arg35[%c0_240, %c1_241], %336 {strides = array<i32>} : memref<24x34xf32, #tpu.memory_space<vmem>>, vector<4x16xf32>,
    %cst_242 = arith.constant 0.000000e+00 : f32
    %338 = vector.broadcast %cst_242 : f32 to vector<4x1xf32>
    %c0_243 = arith.constant 0 : index
    %c0_244 = arith.constant 0 : index
    %339 = vector.load %arg35[%c0_243, %c0_244] : memref<24x34xf32, #tpu.memory_space<vmem>>, vector<4x1xf32>
    tpu.vector_store %arg35[%c0_243, %c0_244], %338 {strides = array<i32>} : memref<24x34xf32, #tpu.memory_space<vmem>>, vector<4x1xf32>,
    %340 = vector.extract_strided_slice %335 {offsets = [0, 17], sizes = [4, 16], strides = [1, 1]} : vector<4x34xf32> to vector<4x16xf32>
    %c0_245 = arith.constant 0 : index
    %c18_246 = arith.constant 18 : index
    %341 = vector.load %arg35[%c0_245, %c18_246] : memref<24x34xf32, #tpu.memory_space<vmem>>, vector<4x16xf32>
    tpu.vector_store %arg35[%c0_245, %c18_246], %340 {strides = array<i32>} : memref<24x34xf32, #tpu.memory_space<vmem>>, vector<4x16xf32>,
    %cst_247 = arith.constant 0.000000e+00 : f32
    %342 = vector.broadcast %cst_247 : f32 to vector<4x1xf32>
    %c0_248 = arith.constant 0 : index
    %c17_249 = arith.constant 17 : index
    %343 = vector.load %arg35[%c0_248, %c17_249] : memref<24x34xf32, #tpu.memory_space<vmem>>, vector<4x1xf32>
    tpu.vector_store %arg35[%c0_248, %c17_249], %342 {strides = array<i32>} : memref<24x34xf32, #tpu.memory_space<vmem>>, vector<4x1xf32>,
    %344 = vector.extract_strided_slice %335 {offsets = [0, 0], sizes = [4, 17], strides = [1, 1]} : vector<4x34xf32> to vector<4x17xf32>
    %c4_250 = arith.constant 4 : index
    %c0_251 = arith.constant 0 : index
    %345 = vector.load %arg35[%c4_250, %c0_251] : memref<24x34xf32, #tpu.memory_space<vmem>>, vector<4x17xf32>
    tpu.vector_store %arg35[%c4_250, %c0_251], %344 {strides = array<i32>} : memref<24x34xf32, #tpu.memory_space<vmem>>, vector<4x17xf32>,
    %346 = vector.extract_strided_slice %335 {offsets = [0, 17], sizes = [4, 17], strides = [1, 1]} : vector<4x34xf32> to vector<4x17xf32>
    %c4_252 = arith.constant 4 : index
    %c17_253 = arith.constant 17 : index
    %347 = vector.load %arg35[%c4_252, %c17_253] : memref<24x34xf32, #tpu.memory_space<vmem>>, vector<4x17xf32>
    tpu.vector_store %arg35[%c4_252, %c17_253], %346 {strides = array<i32>} : memref<24x34xf32, #tpu.memory_space<vmem>>, vector<4x17xf32>,
    %348 = vector.extract_strided_slice %335 {offsets = [0, 1], sizes = [4, 16], strides = [1, 1]} : vector<4x34xf32> to vector<4x16xf32>
    %c8_254 = arith.constant 8 : index
    %c0_255 = arith.constant 0 : index
    %349 = vector.load %arg35[%c8_254, %c0_255] : memref<24x34xf32, #tpu.memory_space<vmem>>, vector<4x16xf32>
    tpu.vector_store %arg35[%c8_254, %c0_255], %348 {strides = array<i32>} : memref<24x34xf32, #tpu.memory_space<vmem>>, vector<4x16xf32>,
    %cst_256 = arith.constant 0.000000e+00 : f32
    %350 = vector.broadcast %cst_256 : f32 to vector<4x1xf32>
    %c8_257 = arith.constant 8 : index
    %c16_258 = arith.constant 16 : index
    %351 = vector.load %arg35[%c8_257, %c16_258] : memref<24x34xf32, #tpu.memory_space<vmem>>, vector<4x1xf32>
    tpu.vector_store %arg35[%c8_257, %c16_258], %350 {strides = array<i32>} : memref<24x34xf32, #tpu.memory_space<vmem>>, vector<4x1xf32>,
    %352 = vector.extract_strided_slice %335 {offsets = [0, 18], sizes = [4, 16], strides = [1, 1]} : vector<4x34xf32> to vector<4x16xf32>
    %c8_259 = arith.constant 8 : index
    %c17_260 = arith.constant 17 : index
    %353 = vector.load %arg35[%c8_259, %c17_260] : memref<24x34xf32, #tpu.memory_space<vmem>>, vector<4x16xf32>
    tpu.vector_store %arg35[%c8_259, %c17_260], %352 {strides = array<i32>} : memref<24x34xf32, #tpu.memory_space<vmem>>, vector<4x16xf32>,
    %cst_261 = arith.constant 0.000000e+00 : f32
    %354 = vector.broadcast %cst_261 : f32 to vector<4x1xf32>
    %c8_262 = arith.constant 8 : index
    %c33_263 = arith.constant 33 : index
    %355 = vector.load %arg35[%c8_262, %c33_263] : memref<24x34xf32, #tpu.memory_space<vmem>>, vector<4x1xf32>
    tpu.vector_store %arg35[%c8_262, %c33_263], %354 {strides = array<i32>} : memref<24x34xf32, #tpu.memory_space<vmem>>, vector<4x1xf32>,
    %c0_264 = arith.constant 0 : index
    %c0_265 = arith.constant 0 : index
    %356 = vector.load %arg24[%c0_264, %c0_265] : memref<4x12xf32, #tpu.memory_space<vmem>>, vector<4x12xf32>
    %c0_266 = arith.constant 0 : index
    %c0_267 = arith.constant 0 : index
    %357 = vector.load %arg35[%c0_266, %c0_267] : memref<24x34xf32, #tpu.memory_space<vmem>>, vector<12x34xf32>
    %cst_268 = arith.constant dense<0.000000e+00> : vector<4x34xf32>
    %358 = tpu.matmul %356, %357, %cst_268 {dimension_numbers = #tpu.dot_dimension_numbers<[1], [0], [0], [1], [0, 0, 1, 1], [], []>} : vector<4x12xf32>, vector<12x34xf32>, vector<4x34xf32> -> vector<4x34xf32>
    %cst_269 = arith.constant dense<0.000000e+00> : vector<4xf32>
    %359 = vector.multi_reduction <add>, %358, %cst_269 [1] : vector<4x34xf32> to vector<4xf32>
    %360 = vector.shape_cast %359 : vector<4xf32> to vector<4x1xf32>
    %cst_270 = arith.constant 0.0294117648 : f32
    %361 = vector.broadcast %cst_270 : f32 to vector<4x1xf32>
    %362 = arith.mulf %360, %361 : vector<4x1xf32>
    %363 = vector.broadcast %362 : vector<4x1xf32> to vector<4x34xf32>
    %364 = arith.subf %358, %363 : vector<4x34xf32>
    %365 = arith.mulf %364, %364 : vector<4x34xf32>
    %cst_271 = arith.constant dense<0.000000e+00> : vector<4xf32>
    %366 = vector.multi_reduction <add>, %365, %cst_271 [1] : vector<4x34xf32> to vector<4xf32>
    %367 = vector.shape_cast %366 : vector<4xf32> to vector<4x1xf32>
    %cst_272 = arith.constant 0.0294117648 : f32
    %368 = vector.broadcast %cst_272 : f32 to vector<4x1xf32>
    %369 = arith.mulf %367, %368 : vector<4x1xf32>
    %cst_273 = arith.constant 9.99999974E-6 : f32
    %370 = vector.broadcast %cst_273 : f32 to vector<4x1xf32>
    %371 = arith.addf %369, %370 : vector<4x1xf32>
    %372 = math.rsqrt %371 : vector<4x1xf32>
    %373 = vector.broadcast %372 : vector<4x1xf32> to vector<4x34xf32>
    %374 = arith.mulf %364, %373 : vector<4x34xf32>
    %c0_274 = arith.constant 0 : index
    %c0_275 = arith.constant 0 : index
    %375 = vector.load %arg25[%c0_274, %c0_275] : memref<4x1xf32, #tpu.memory_space<vmem>>, vector<4x1xf32>
    %376 = vector.broadcast %375 : vector<4x1xf32> to vector<4x34xf32>
    %377 = arith.mulf %374, %376 : vector<4x34xf32>
    %c0_276 = arith.constant 0 : index
    %c0_277 = arith.constant 0 : index
    %378 = vector.load %arg26[%c0_276, %c0_277] : memref<4x1xf32, #tpu.memory_space<vmem>>, vector<4x1xf32>
    %379 = vector.broadcast %378 : vector<4x1xf32> to vector<4x34xf32>
    %380 = arith.addf %377, %379 : vector<4x34xf32>
    %cst_278 = arith.constant 0.000000e+00 : f32
    %381 = vector.broadcast %cst_278 : f32 to vector<4x34xf32>
    %382 = arith.cmpf oge, %380, %381 : vector<4x34xf32>
    %cst_279 = arith.constant 0.00999999977 : f32
    %383 = vector.broadcast %cst_279 : f32 to vector<4x34xf32>
    %384 = arith.mulf %383, %380 : vector<4x34xf32>
    %385 = arith.select %382, %380, %384 : vector<4x34xi1>, vector<4x34xf32>
    %386 = vector.extract_strided_slice %385 {offsets = [0, 0], sizes = [4, 16], strides = [1, 1]} : vector<4x34xf32> to vector<4x16xf32>
    %c0_280 = arith.constant 0 : index
    %c1_281 = arith.constant 1 : index
    %387 = vector.load %arg35[%c0_280, %c1_281] : memref<24x34xf32, #tpu.memory_space<vmem>>, vector<4x16xf32>
    tpu.vector_store %arg35[%c0_280, %c1_281], %386 {strides = array<i32>} : memref<24x34xf32, #tpu.memory_space<vmem>>, vector<4x16xf32>,
    %cst_282 = arith.constant 0.000000e+00 : f32
    %388 = vector.broadcast %cst_282 : f32 to vector<4x1xf32>
    %c0_283 = arith.constant 0 : index
    %c0_284 = arith.constant 0 : index
    %389 = vector.load %arg35[%c0_283, %c0_284] : memref<24x34xf32, #tpu.memory_space<vmem>>, vector<4x1xf32>
    tpu.vector_store %arg35[%c0_283, %c0_284], %388 {strides = array<i32>} : memref<24x34xf32, #tpu.memory_space<vmem>>, vector<4x1xf32>,
    %390 = vector.extract_strided_slice %385 {offsets = [0, 17], sizes = [4, 16], strides = [1, 1]} : vector<4x34xf32> to vector<4x16xf32>
    %c0_285 = arith.constant 0 : index
    %c18_286 = arith.constant 18 : index
    %391 = vector.load %arg35[%c0_285, %c18_286] : memref<24x34xf32, #tpu.memory_space<vmem>>, vector<4x16xf32>
    tpu.vector_store %arg35[%c0_285, %c18_286], %390 {strides = array<i32>} : memref<24x34xf32, #tpu.memory_space<vmem>>, vector<4x16xf32>,
    %cst_287 = arith.constant 0.000000e+00 : f32
    %392 = vector.broadcast %cst_287 : f32 to vector<4x1xf32>
    %c0_288 = arith.constant 0 : index
    %c17_289 = arith.constant 17 : index
    %393 = vector.load %arg35[%c0_288, %c17_289] : memref<24x34xf32, #tpu.memory_space<vmem>>, vector<4x1xf32>
    tpu.vector_store %arg35[%c0_288, %c17_289], %392 {strides = array<i32>} : memref<24x34xf32, #tpu.memory_space<vmem>>, vector<4x1xf32>,
    %394 = vector.extract_strided_slice %385 {offsets = [0, 0], sizes = [4, 17], strides = [1, 1]} : vector<4x34xf32> to vector<4x17xf32>
    %c4_290 = arith.constant 4 : index
    %c0_291 = arith.constant 0 : index
    %395 = vector.load %arg35[%c4_290, %c0_291] : memref<24x34xf32, #tpu.memory_space<vmem>>, vector<4x17xf32>
    tpu.vector_store %arg35[%c4_290, %c0_291], %394 {strides = array<i32>} : memref<24x34xf32, #tpu.memory_space<vmem>>, vector<4x17xf32>,
    %396 = vector.extract_strided_slice %385 {offsets = [0, 17], sizes = [4, 17], strides = [1, 1]} : vector<4x34xf32> to vector<4x17xf32>
    %c4_292 = arith.constant 4 : index
    %c17_293 = arith.constant 17 : index
    %397 = vector.load %arg35[%c4_292, %c17_293] : memref<24x34xf32, #tpu.memory_space<vmem>>, vector<4x17xf32>
    tpu.vector_store %arg35[%c4_292, %c17_293], %396 {strides = array<i32>} : memref<24x34xf32, #tpu.memory_space<vmem>>, vector<4x17xf32>,
    %398 = vector.extract_strided_slice %385 {offsets = [0, 1], sizes = [4, 16], strides = [1, 1]} : vector<4x34xf32> to vector<4x16xf32>
    %c8_294 = arith.constant 8 : index
    %c0_295 = arith.constant 0 : index
    %399 = vector.load %arg35[%c8_294, %c0_295] : memref<24x34xf32, #tpu.memory_space<vmem>>, vector<4x16xf32>
    tpu.vector_store %arg35[%c8_294, %c0_295], %398 {strides = array<i32>} : memref<24x34xf32, #tpu.memory_space<vmem>>, vector<4x16xf32>,
    %cst_296 = arith.constant 0.000000e+00 : f32
    %400 = vector.broadcast %cst_296 : f32 to vector<4x1xf32>
    %c8_297 = arith.constant 8 : index
    %c16_298 = arith.constant 16 : index
    %401 = vector.load %arg35[%c8_297, %c16_298] : memref<24x34xf32, #tpu.memory_space<vmem>>, vector<4x1xf32>
    tpu.vector_store %arg35[%c8_297, %c16_298], %400 {strides = array<i32>} : memref<24x34xf32, #tpu.memory_space<vmem>>, vector<4x1xf32>,
    %402 = vector.extract_strided_slice %385 {offsets = [0, 18], sizes = [4, 16], strides = [1, 1]} : vector<4x34xf32> to vector<4x16xf32>
    %c8_299 = arith.constant 8 : index
    %c17_300 = arith.constant 17 : index
    %403 = vector.load %arg35[%c8_299, %c17_300] : memref<24x34xf32, #tpu.memory_space<vmem>>, vector<4x16xf32>
    tpu.vector_store %arg35[%c8_299, %c17_300], %402 {strides = array<i32>} : memref<24x34xf32, #tpu.memory_space<vmem>>, vector<4x16xf32>,
    %cst_301 = arith.constant 0.000000e+00 : f32
    %404 = vector.broadcast %cst_301 : f32 to vector<4x1xf32>
    %c8_302 = arith.constant 8 : index
    %c33_303 = arith.constant 33 : index
    %405 = vector.load %arg35[%c8_302, %c33_303] : memref<24x34xf32, #tpu.memory_space<vmem>>, vector<4x1xf32>
    tpu.vector_store %arg35[%c8_302, %c33_303], %404 {strides = array<i32>} : memref<24x34xf32, #tpu.memory_space<vmem>>, vector<4x1xf32>,
    %c0_304 = arith.constant 0 : index
    %c0_305 = arith.constant 0 : index
    %406 = vector.load %arg27[%c0_304, %c0_305] : memref<4x12xf32, #tpu.memory_space<vmem>>, vector<4x12xf32>
    %c0_306 = arith.constant 0 : index
    %c0_307 = arith.constant 0 : index
    %407 = vector.load %arg35[%c0_306, %c0_307] : memref<24x34xf32, #tpu.memory_space<vmem>>, vector<12x34xf32>
    %cst_308 = arith.constant dense<0.000000e+00> : vector<4x34xf32>
    %408 = tpu.matmul %406, %407, %cst_308 {dimension_numbers = #tpu.dot_dimension_numbers<[1], [0], [0], [1], [0, 0, 1, 1], [], []>} : vector<4x12xf32>, vector<12x34xf32>, vector<4x34xf32> -> vector<4x34xf32>
    %409 = arith.addf %408, %308 : vector<4x34xf32>
    %cst_309 = arith.constant dense<0.000000e+00> : vector<4xf32>
    %410 = vector.multi_reduction <add>, %409, %cst_309 [1] : vector<4x34xf32> to vector<4xf32>
    %411 = vector.shape_cast %410 : vector<4xf32> to vector<4x1xf32>
    %cst_310 = arith.constant 0.0294117648 : f32
    %412 = vector.broadcast %cst_310 : f32 to vector<4x1xf32>
    %413 = arith.mulf %411, %412 : vector<4x1xf32>
    %414 = vector.broadcast %413 : vector<4x1xf32> to vector<4x34xf32>
    %415 = arith.subf %409, %414 : vector<4x34xf32>
    %416 = arith.mulf %415, %415 : vector<4x34xf32>
    %cst_311 = arith.constant dense<0.000000e+00> : vector<4xf32>
    %417 = vector.multi_reduction <add>, %416, %cst_311 [1] : vector<4x34xf32> to vector<4xf32>
    %418 = vector.shape_cast %417 : vector<4xf32> to vector<4x1xf32>
    %cst_312 = arith.constant 0.0294117648 : f32
    %419 = vector.broadcast %cst_312 : f32 to vector<4x1xf32>
    %420 = arith.mulf %418, %419 : vector<4x1xf32>
    %cst_313 = arith.constant 9.99999974E-6 : f32
    %421 = vector.broadcast %cst_313 : f32 to vector<4x1xf32>
    %422 = arith.addf %420, %421 : vector<4x1xf32>
    %423 = math.rsqrt %422 : vector<4x1xf32>
    %424 = vector.broadcast %423 : vector<4x1xf32> to vector<4x34xf32>
    %425 = arith.mulf %415, %424 : vector<4x34xf32>
    %c0_314 = arith.constant 0 : index
    %c0_315 = arith.constant 0 : index
    %426 = vector.load %arg28[%c0_314, %c0_315] : memref<4x1xf32, #tpu.memory_space<vmem>>, vector<4x1xf32>
    %427 = vector.broadcast %426 : vector<4x1xf32> to vector<4x34xf32>
    %428 = arith.mulf %425, %427 : vector<4x34xf32>
    %c0_316 = arith.constant 0 : index
    %c0_317 = arith.constant 0 : index
    %429 = vector.load %arg29[%c0_316, %c0_317] : memref<4x1xf32, #tpu.memory_space<vmem>>, vector<4x1xf32>
    %430 = vector.broadcast %429 : vector<4x1xf32> to vector<4x34xf32>
    %431 = arith.addf %428, %430 : vector<4x34xf32>
    %cst_318 = arith.constant 0.000000e+00 : f32
    %432 = vector.broadcast %cst_318 : f32 to vector<4x34xf32>
    %433 = arith.cmpf oge, %431, %432 : vector<4x34xf32>
    %cst_319 = arith.constant 0.00999999977 : f32
    %434 = vector.broadcast %cst_319 : f32 to vector<4x34xf32>
    %435 = arith.mulf %434, %431 : vector<4x34xf32>
    %436 = arith.select %433, %431, %435 : vector<4x34xi1>, vector<4x34xf32>
    %437 = vector.extract_strided_slice %436 {offsets = [0, 0], sizes = [4, 16], strides = [1, 1]} : vector<4x34xf32> to vector<4x16xf32>
    %c0_320 = arith.constant 0 : index
    %c1_321 = arith.constant 1 : index
    %438 = vector.load %arg35[%c0_320, %c1_321] : memref<24x34xf32, #tpu.memory_space<vmem>>, vector<4x16xf32>
    tpu.vector_store %arg35[%c0_320, %c1_321], %437 {strides = array<i32>} : memref<24x34xf32, #tpu.memory_space<vmem>>, vector<4x16xf32>,
    %cst_322 = arith.constant 0.000000e+00 : f32
    %439 = vector.broadcast %cst_322 : f32 to vector<4x1xf32>
    %c0_323 = arith.constant 0 : index
    %c0_324 = arith.constant 0 : index
    %440 = vector.load %arg35[%c0_323, %c0_324] : memref<24x34xf32, #tpu.memory_space<vmem>>, vector<4x1xf32>
    tpu.vector_store %arg35[%c0_323, %c0_324], %439 {strides = array<i32>} : memref<24x34xf32, #tpu.memory_space<vmem>>, vector<4x1xf32>,
    %441 = vector.extract_strided_slice %436 {offsets = [0, 17], sizes = [4, 16], strides = [1, 1]} : vector<4x34xf32> to vector<4x16xf32>
    %c0_325 = arith.constant 0 : index
    %c18_326 = arith.constant 18 : index
    %442 = vector.load %arg35[%c0_325, %c18_326] : memref<24x34xf32, #tpu.memory_space<vmem>>, vector<4x16xf32>
    tpu.vector_store %arg35[%c0_325, %c18_326], %441 {strides = array<i32>} : memref<24x34xf32, #tpu.memory_space<vmem>>, vector<4x16xf32>,
    %cst_327 = arith.constant 0.000000e+00 : f32
    %443 = vector.broadcast %cst_327 : f32 to vector<4x1xf32>
    %c0_328 = arith.constant 0 : index
    %c17_329 = arith.constant 17 : index
    %444 = vector.load %arg35[%c0_328, %c17_329] : memref<24x34xf32, #tpu.memory_space<vmem>>, vector<4x1xf32>
    tpu.vector_store %arg35[%c0_328, %c17_329], %443 {strides = array<i32>} : memref<24x34xf32, #tpu.memory_space<vmem>>, vector<4x1xf32>,
    %445 = vector.extract_strided_slice %436 {offsets = [0, 0], sizes = [4, 17], strides = [1, 1]} : vector<4x34xf32> to vector<4x17xf32>
    %c4_330 = arith.constant 4 : index
    %c0_331 = arith.constant 0 : index
    %446 = vector.load %arg35[%c4_330, %c0_331] : memref<24x34xf32, #tpu.memory_space<vmem>>, vector<4x17xf32>
    tpu.vector_store %arg35[%c4_330, %c0_331], %445 {strides = array<i32>} : memref<24x34xf32, #tpu.memory_space<vmem>>, vector<4x17xf32>,
    %447 = vector.extract_strided_slice %436 {offsets = [0, 17], sizes = [4, 17], strides = [1, 1]} : vector<4x34xf32> to vector<4x17xf32>
    %c4_332 = arith.constant 4 : index
    %c17_333 = arith.constant 17 : index
    %448 = vector.load %arg35[%c4_332, %c17_333] : memref<24x34xf32, #tpu.memory_space<vmem>>, vector<4x17xf32>
    tpu.vector_store %arg35[%c4_332, %c17_333], %447 {strides = array<i32>} : memref<24x34xf32, #tpu.memory_space<vmem>>, vector<4x17xf32>,
    %449 = vector.extract_strided_slice %436 {offsets = [0, 1], sizes = [4, 16], strides = [1, 1]} : vector<4x34xf32> to vector<4x16xf32>
    %c8_334 = arith.constant 8 : index
    %c0_335 = arith.constant 0 : index
    %450 = vector.load %arg35[%c8_334, %c0_335] : memref<24x34xf32, #tpu.memory_space<vmem>>, vector<4x16xf32>
    tpu.vector_store %arg35[%c8_334, %c0_335], %449 {strides = array<i32>} : memref<24x34xf32, #tpu.memory_space<vmem>>, vector<4x16xf32>,
    %cst_336 = arith.constant 0.000000e+00 : f32
    %451 = vector.broadcast %cst_336 : f32 to vector<4x1xf32>
    %c8_337 = arith.constant 8 : index
    %c16_338 = arith.constant 16 : index
    %452 = vector.load %arg35[%c8_337, %c16_338] : memref<24x34xf32, #tpu.memory_space<vmem>>, vector<4x1xf32>
    tpu.vector_store %arg35[%c8_337, %c16_338], %451 {strides = array<i32>} : memref<24x34xf32, #tpu.memory_space<vmem>>, vector<4x1xf32>,
    %453 = vector.extract_strided_slice %436 {offsets = [0, 18], sizes = [4, 16], strides = [1, 1]} : vector<4x34xf32> to vector<4x16xf32>
    %c8_339 = arith.constant 8 : index
    %c17_340 = arith.constant 17 : index
    %454 = vector.load %arg35[%c8_339, %c17_340] : memref<24x34xf32, #tpu.memory_space<vmem>>, vector<4x16xf32>
    tpu.vector_store %arg35[%c8_339, %c17_340], %453 {strides = array<i32>} : memref<24x34xf32, #tpu.memory_space<vmem>>, vector<4x16xf32>,
    %cst_341 = arith.constant 0.000000e+00 : f32
    %455 = vector.broadcast %cst_341 : f32 to vector<4x1xf32>
    %c8_342 = arith.constant 8 : index
    %c33_343 = arith.constant 33 : index
    %456 = vector.load %arg35[%c8_342, %c33_343] : memref<24x34xf32, #tpu.memory_space<vmem>>, vector<4x1xf32>
    tpu.vector_store %arg35[%c8_342, %c33_343], %455 {strides = array<i32>} : memref<24x34xf32, #tpu.memory_space<vmem>>, vector<4x1xf32>,
    %c0_344 = arith.constant 0 : index
    %c0_345 = arith.constant 0 : index
    %457 = vector.load %arg30[%c0_344, %c0_345] : memref<4x12xf32, #tpu.memory_space<vmem>>, vector<4x12xf32>
    %c0_346 = arith.constant 0 : index
    %c0_347 = arith.constant 0 : index
    %458 = vector.load %arg35[%c0_346, %c0_347] : memref<24x34xf32, #tpu.memory_space<vmem>>, vector<12x34xf32>
    %cst_348 = arith.constant dense<0.000000e+00> : vector<4x34xf32>
    %459 = tpu.matmul %457, %458, %cst_348 {dimension_numbers = #tpu.dot_dimension_numbers<[1], [0], [0], [1], [0, 0, 1, 1], [], []>} : vector<4x12xf32>, vector<12x34xf32>, vector<4x34xf32> -> vector<4x34xf32>
    %cst_349 = arith.constant dense<0.000000e+00> : vector<4xf32>
    %460 = vector.multi_reduction <add>, %459, %cst_349 [1] : vector<4x34xf32> to vector<4xf32>
    %461 = vector.shape_cast %460 : vector<4xf32> to vector<4x1xf32>
    %cst_350 = arith.constant 0.0294117648 : f32
    %462 = vector.broadcast %cst_350 : f32 to vector<4x1xf32>
    %463 = arith.mulf %461, %462 : vector<4x1xf32>
    %464 = vector.broadcast %463 : vector<4x1xf32> to vector<4x34xf32>
    %465 = arith.subf %459, %464 : vector<4x34xf32>
    %466 = arith.mulf %465, %465 : vector<4x34xf32>
    %cst_351 = arith.constant dense<0.000000e+00> : vector<4xf32>
    %467 = vector.multi_reduction <add>, %466, %cst_351 [1] : vector<4x34xf32> to vector<4xf32>
    %468 = vector.shape_cast %467 : vector<4xf32> to vector<4x1xf32>
    %cst_352 = arith.constant 0.0294117648 : f32
    %469 = vector.broadcast %cst_352 : f32 to vector<4x1xf32>
    %470 = arith.mulf %468, %469 : vector<4x1xf32>
    %cst_353 = arith.constant 9.99999974E-6 : f32
    %471 = vector.broadcast %cst_353 : f32 to vector<4x1xf32>
    %472 = arith.addf %470, %471 : vector<4x1xf32>
    %473 = math.rsqrt %472 : vector<4x1xf32>
    %474 = vector.broadcast %473 : vector<4x1xf32> to vector<4x34xf32>
    %475 = arith.mulf %465, %474 : vector<4x34xf32>
    %c0_354 = arith.constant 0 : index
    %c0_355 = arith.constant 0 : index
    %476 = vector.load %arg31[%c0_354, %c0_355] : memref<4x1xf32, #tpu.memory_space<vmem>>, vector<4x1xf32>
    %477 = vector.broadcast %476 : vector<4x1xf32> to vector<4x34xf32>
    %478 = arith.mulf %475, %477 : vector<4x34xf32>
    %c0_356 = arith.constant 0 : index
    %c0_357 = arith.constant 0 : index
    %479 = vector.load %arg32[%c0_356, %c0_357] : memref<4x1xf32, #tpu.memory_space<vmem>>, vector<4x1xf32>
    %480 = vector.broadcast %479 : vector<4x1xf32> to vector<4x34xf32>
    %481 = arith.addf %478, %480 : vector<4x34xf32>
    %cst_358 = arith.constant 0.000000e+00 : f32
    %482 = vector.broadcast %cst_358 : f32 to vector<4x34xf32>
    %483 = arith.cmpf oge, %481, %482 : vector<4x34xf32>
    %cst_359 = arith.constant 0.00999999977 : f32
    %484 = vector.broadcast %cst_359 : f32 to vector<4x34xf32>
    %485 = arith.mulf %484, %481 : vector<4x34xf32>
    %486 = arith.select %483, %481, %485 : vector<4x34xi1>, vector<4x34xf32>
    %487 = vector.extract_strided_slice %486 {offsets = [0, 0], sizes = [4, 16], strides = [1, 1]} : vector<4x34xf32> to vector<4x16xf32>
    %c0_360 = arith.constant 0 : index
    %c1_361 = arith.constant 1 : index
    %488 = vector.load %arg35[%c0_360, %c1_361] : memref<24x34xf32, #tpu.memory_space<vmem>>, vector<4x16xf32>
    tpu.vector_store %arg35[%c0_360, %c1_361], %487 {strides = array<i32>} : memref<24x34xf32, #tpu.memory_space<vmem>>, vector<4x16xf32>,
    %cst_362 = arith.constant 0.000000e+00 : f32
    %489 = vector.broadcast %cst_362 : f32 to vector<4x1xf32>
    %c0_363 = arith.constant 0 : index
    %c0_364 = arith.constant 0 : index
    %490 = vector.load %arg35[%c0_363, %c0_364] : memref<24x34xf32, #tpu.memory_space<vmem>>, vector<4x1xf32>
    tpu.vector_store %arg35[%c0_363, %c0_364], %489 {strides = array<i32>} : memref<24x34xf32, #tpu.memory_space<vmem>>, vector<4x1xf32>,
    %491 = vector.extract_strided_slice %486 {offsets = [0, 17], sizes = [4, 16], strides = [1, 1]} : vector<4x34xf32> to vector<4x16xf32>
    %c0_365 = arith.constant 0 : index
    %c18_366 = arith.constant 18 : index
    %492 = vector.load %arg35[%c0_365, %c18_366] : memref<24x34xf32, #tpu.memory_space<vmem>>, vector<4x16xf32>
    tpu.vector_store %arg35[%c0_365, %c18_366], %491 {strides = array<i32>} : memref<24x34xf32, #tpu.memory_space<vmem>>, vector<4x16xf32>,
    %cst_367 = arith.constant 0.000000e+00 : f32
    %493 = vector.broadcast %cst_367 : f32 to vector<4x1xf32>
    %c0_368 = arith.constant 0 : index
    %c17_369 = arith.constant 17 : index
    %494 = vector.load %arg35[%c0_368, %c17_369] : memref<24x34xf32, #tpu.memory_space<vmem>>, vector<4x1xf32>
    tpu.vector_store %arg35[%c0_368, %c17_369], %493 {strides = array<i32>} : memref<24x34xf32, #tpu.memory_space<vmem>>, vector<4x1xf32>,
    %495 = vector.extract_strided_slice %486 {offsets = [0, 0], sizes = [4, 17], strides = [1, 1]} : vector<4x34xf32> to vector<4x17xf32>
    %c4_370 = arith.constant 4 : index
    %c0_371 = arith.constant 0 : index
    %496 = vector.load %arg35[%c4_370, %c0_371] : memref<24x34xf32, #tpu.memory_space<vmem>>, vector<4x17xf32>
    tpu.vector_store %arg35[%c4_370, %c0_371], %495 {strides = array<i32>} : memref<24x34xf32, #tpu.memory_space<vmem>>, vector<4x17xf32>,
    %497 = vector.extract_strided_slice %486 {offsets = [0, 17], sizes = [4, 17], strides = [1, 1]} : vector<4x34xf32> to vector<4x17xf32>
    %c4_372 = arith.constant 4 : index
    %c17_373 = arith.constant 17 : index
    %498 = vector.load %arg35[%c4_372, %c17_373] : memref<24x34xf32, #tpu.memory_space<vmem>>, vector<4x17xf32>
    tpu.vector_store %arg35[%c4_372, %c17_373], %497 {strides = array<i32>} : memref<24x34xf32, #tpu.memory_space<vmem>>, vector<4x17xf32>,
    %499 = vector.extract_strided_slice %486 {offsets = [0, 1], sizes = [4, 16], strides = [1, 1]} : vector<4x34xf32> to vector<4x16xf32>
    %c8_374 = arith.constant 8 : index
    %c0_375 = arith.constant 0 : index
    %500 = vector.load %arg35[%c8_374, %c0_375] : memref<24x34xf32, #tpu.memory_space<vmem>>, vector<4x16xf32>
    tpu.vector_store %arg35[%c8_374, %c0_375], %499 {strides = array<i32>} : memref<24x34xf32, #tpu.memory_space<vmem>>, vector<4x16xf32>,
    %cst_376 = arith.constant 0.000000e+00 : f32
    %501 = vector.broadcast %cst_376 : f32 to vector<4x1xf32>
    %c8_377 = arith.constant 8 : index
    %c16_378 = arith.constant 16 : index
    %502 = vector.load %arg35[%c8_377, %c16_378] : memref<24x34xf32, #tpu.memory_space<vmem>>, vector<4x1xf32>
    tpu.vector_store %arg35[%c8_377, %c16_378], %501 {strides = array<i32>} : memref<24x34xf32, #tpu.memory_space<vmem>>, vector<4x1xf32>,
    %503 = vector.extract_strided_slice %486 {offsets = [0, 18], sizes = [4, 16], strides = [1, 1]} : vector<4x34xf32> to vector<4x16xf32>
    %c8_379 = arith.constant 8 : index
    %c17_380 = arith.constant 17 : index
    %504 = vector.load %arg35[%c8_379, %c17_380] : memref<24x34xf32, #tpu.memory_space<vmem>>, vector<4x16xf32>
    tpu.vector_store %arg35[%c8_379, %c17_380], %503 {strides = array<i32>} : memref<24x34xf32, #tpu.memory_space<vmem>>, vector<4x16xf32>,
    %cst_381 = arith.constant 0.000000e+00 : f32
    %505 = vector.broadcast %cst_381 : f32 to vector<4x1xf32>
    %c8_382 = arith.constant 8 : index
    %c33_383 = arith.constant 33 : index
    %506 = vector.load %arg35[%c8_382, %c33_383] : memref<24x34xf32, #tpu.memory_space<vmem>>, vector<4x1xf32>
    tpu.vector_store %arg35[%c8_382, %c33_383], %505 {strides = array<i32>} : memref<24x34xf32, #tpu.memory_space<vmem>>, vector<4x1xf32>,
    %c0_384 = arith.constant 0 : index
    %c0_385 = arith.constant 0 : index
    %507 = vector.load %arg33[%c0_384, %c0_385] : memref<4x12xf32, #tpu.memory_space<vmem>>, vector<4x12xf32>
    %c0_386 = arith.constant 0 : index
    %c0_387 = arith.constant 0 : index
    %508 = vector.load %arg35[%c0_386, %c0_387] : memref<24x34xf32, #tpu.memory_space<vmem>>, vector<12x34xf32>
    %cst_388 = arith.constant dense<0.000000e+00> : vector<4x34xf32>
    %509 = tpu.matmul %507, %508, %cst_388 {dimension_numbers = #tpu.dot_dimension_numbers<[1], [0], [0], [1], [0, 0, 1, 1], [], []>} : vector<4x12xf32>, vector<12x34xf32>, vector<4x34xf32> -> vector<4x34xf32>
    %510 = arith.addf %509, %409 : vector<4x34xf32>
    %c0_389 = arith.constant 0 : index
    %c0_390 = arith.constant 0 : index
    %511 = vector.load %arg34[%c0_389, %c0_390] : memref<4x34xf32, #tpu.memory_space<vmem>>, vector<4x34xf32>
    tpu.vector_store %arg34[%c0_389, %c0_390], %510 {strides = array<i32>} : memref<4x34xf32, #tpu.memory_space<vmem>>, vector<4x34xf32>,
    return
  }
}

</mosaic_0001>

<bundles_post_ra>
// kernel: up_block_res1d.1
= control target key start
LH: loop header
LB: loop body
LE: loop exit
PB: predicated region body
PF: predicated region fallthrough
CT: control target
= control target key end

     0   :  { %v2142_v0 = vmov 0   ;;  %s2143_s6 = smov 2   ;;  %s2144_s10 = smov 3   ;;  %vm143_vm0 = vcmask 125952   ;;  %vm633_vm1 = vcmask 273408   ;;  %v2148_v14 = vmov 0.0   ;;  %s2577_s0 = inlined_call_operand.smem [shape: u32[35], index: -1, kind: input, shape index: {}] }
   0x1   :  { %s1_s5 = sld [smem:[%s2577_s0]]   ;;  %2120 = vset.pattern.permute.xlu1 %v2142_v0  ;;  %2121 = vset.pattern.permute.xlu0 %v2142_v0  ;;  %s2145_s14 = smov 1   ;;  %vm2149_vm2 = vmmov 0   ;;  %vm179_vm4 = vcmask 1043456   ;;  %vm175_vm5 = vcmask 31744   ;;  %vm333_vm6 = vcmask 130048  }
   0x2   :  { %s1866_s9 = sld [smem:[%s2577_s0 + %s2143_s6]]   ;;  %s2146_s18 = smov 8   ;;  %1977 = vmatprep.subr.mxu0 %v2148_v14  ;;  %1982 = vmatprep.subr.mxu1 %v2148_v14  ;;  %vm714_vm8 = vcmask 134144   ;;  %vm716_vm9 = vcmask 273544   ;;  %vm724_vm11 = vcmask 134272   ;;  %vm726_vm12 = vcmask 265352  }
   0x3   :  { %s1867_s13 = sld [smem:[%s2577_s0 + %s2144_s10]]   ;;  %s2147_s22 = smov 7   ;;  %1979 = vmatprep.mubr.msk.f32.mxu0 %vm2149_vm2, %v2148_v14  ;;  %1984 = vmatprep.mubr.msk.f32.mxu1 %vm2149_vm2, %v2148_v14  ;;  %vm728_vm13 = vcmask 273672   ;;  %vm698_vm14 = vcmask 134152   ;;  %vm700_vm15 = vcmask 3072  }
   0x4   :  { %s1865_s17 = sld [smem:[%s2577_s0 + %s2145_s14]]   ;;  %s2150_s26 = smov 4  }
   0x5   :  { %s1872_s21 = sld [smem:[%s2577_s0 + %s2146_s18]]   ;;  %s2151_s30 = smov 5  }
   0x6   :  { %s1871_s25 = sld [smem:[%s2577_s0 + %s2147_s22]]   ;;  %s2152_s4 = smov 6  }
   0x7   :  { %v142_v1 = vld [vmem:[%s1_s5] sm:$0xf]  ;;  %s2220_s29 = sld [smem:[%s2577_s0 + %s2150_s26]]   ;;  %s2153_s8 = smov 9  }
   0x8   :  { %v144_v2 = vsel %vm143_vm0, %v142_v1, 0.0  ;;  %v157_v3 = vld [vmem:[%s1866_s9] sm:$0xf]  ;;  %s2225_s3 = sld [smem:[%s2577_s0 + %s2151_s30]]   ;;  %s2154_s12 = smov 127  }
   0x9   :  { %145 = vadd.xlane.f32.xlu0 %v144_v2  ;;  %160 = vperm.xlu1 %2120, %v157_v3   ;;  %v164_v4 = vld [vmem:[%s1867_s13] sm:$0xf]  ;;  %s1870_s7 = sld [smem:[%s2577_s0 + %s2152_s4]]   ;;  %s2155_s13 = smov 10  }
   0xa   :  { %v2200_v5 = vld [vmem:[%s1865_s17] sm:$0xf]  ;;  %s1873_s11 = sld [smem:[%s2577_s0 + %s2153_s8]]   ;;  %s2156_s18 = smov 12  }
   0xb   :  { %v664_v6 = vsel %vm633_vm1, %v2200_v5, 0.0  ;;  %v677_v7 = vld [vmem:[%s1872_s21] sm:$0xf]  ;;  %s1874_s17 = sld [smem:[%s2577_s0 + %s2155_s13]]   ;;  %s2157_s22 = smov 14  }
   0xc   :  { %v654_v8 = vld [vmem:[%s1871_s25] sm:$0xf]  ;;  %s1876_s21 = sld [smem:[%s2577_s0 + %s2156_s18]]   ;;  %s2158_s26 = smov 11  }
   0xd   :  { %167 = vperm.xlu1 %2120, %v164_v4   ;;  %v174_v25 = vld [vmem:[%s2220_s29] sm:$0xf]  ;;  %v1901_v26 = vld [vmem:[%s2220_s29 + $0x4] sm:$0xf]  ;;  %v1908_v35 = vld [vmem:[%s2220_s29 + $0x8] sm:$0xf]  ;;  %s1878_s25 = sld [smem:[%s2577_s0 + %s2157_s22]]  }
   0xe   :  { %v1905_v28 = vld [vmem:[%s2225_s3 + $0x18] sm:$0xff]  ;;  %v254_v29 = vld [vmem:[%s2225_s3 + $0x8] sm:$0xff]  ;;  %v1904_v30 = vld [vmem:[%s2225_s3 + $0x10] sm:$0xff]  ;;  %s1875_s29 = sld [smem:[%s2577_s0 + %s2158_s26]]   ;;  %s2159_s30 = smov 15  }
   0xf   :  { %v253_v31 = vld [vmem:[%s2225_s3] sm:$0xff]  ;;  %v1912_v37 = vld [vmem:[%s2225_s3 + $0x28] sm:$0xff]  ;;  %s2160_s4 = smov 124   ;;  %s2161_s5 = smov 13  }
  0x10   :  { %v1911_v38 = vld [vmem:[%s2225_s3 + $0x20] sm:$0xff]  ;;  %s1879_s3 = sld [smem:[%s2577_s0 + %s2159_s30]]   ;;  %s2162_s9 = smov 17  }
  0x11   :  { %v647_v55 = vld [vmem:[%s1870_s7] sm:$0xf]  ;;  %s1877_s8 = sld [smem:[%s2577_s0 + %s2161_s5]]   ;;  %s2163_s15 = smov 16  }
  0x12   :  { %v684_v61 = vld [vmem:[%s1873_s11] sm:$0xf]  ;;  %s1881_s13 = sld [smem:[%s2577_s0 + %s2162_s9]]   ;;  %s2164_s19 = smov 18  }
  0x13   :  { %s1880_s18 = sld [smem:[%s2577_s0 + %s2163_s15]]   ;;  %s2165_s23 = smov 20  }
  0x14   :  { %s1882_s22 = sld [smem:[%s2577_s0 + %s2164_s19]]   ;;  %s2166_s27 = smov 19  }
  0x15   :  { %s1884_s26 = sld [smem:[%s2577_s0 + %s2165_s23]]   ;;  %s2167_s1 = smov 21  }
  0x16   :  { %s1883_s30 = sld [smem:[%s2577_s0 + %s2166_s27]]   ;;  %s2168_s5 = smov 23  }
  0x17   :  { %s2169_s9 = smov 22   ;;  %s2170_s15 = smov 24  }
  0x18   :  { %s2171_s19 = smov 26   ;;  %s2172_s23 = smov 25  }
  0x19   :  { %s2173_s27 = smov 27  }
  0x31   :  { %665 = vadd.xlane.f32.xlu1 %v664_v6 }
  0x42   :  { %680 = vperm.xlu1 %2120, %v677_v7  }
  0x46   :  { %657 = vperm.xlu1 %2120, %v654_v8  }
  0x84   :  { %v161_v18 = vpop.permute.xlu1 %160 }
  0x88   :  { %v168_v22 = vpop.permute.xlu1 %167 }
  0x92   :  { %v146_v9 = vpop.xlane.xlu0 %145 }
  0x93   :  { %v147_v10 = vmul.f32 0.0625, %v146_v9 }
  0x95   :  { %v148_v11 = vsub.f32 %v142_v1, %v147_v10 }
  0x97   :  { %v149_v12 = vmul.f32 %v148_v11, %v148_v11 }
  0x99   :  { %v150_v13 = vsel %vm143_vm0, %v149_v12, 0.0 }
  0x9a   :  { %151 = vadd.xlane.f32.xlu0 %v150_v13 }
  0xba   :  { %v666_v46 = vpop.xlane.xlu1 %665 }
  0xbb   :  { %v667_v47 = vmul.f32 0.029411765, %v666_v46 }
  0xbd   :  { %v668_v48 = vsub.f32 %v2200_v5, %v667_v47 }
  0xbe   :  { %v681_v8 = vpop.permute.xlu1 %680 }
  0xbf   :  { %v669_v51 = vmul.f32 %v668_v48, %v668_v48 }
  0xc1   :  { %v670_v54 = vsel %vm633_vm1, %v669_v51, 0.0 }
 0x123   :  { %v152_v15 = vpop.xlane.xlu0 %151 }
 0x124   :  { %v153_v16 = vmul.f32 0.0625, %v152_v15 }
 0x126   :  { %v154_v17 = vadd.f32 1e-05, %v153_v16 }
 0x128   :  { %2122 = vrsqrt.f32 %v154_v17 }
 0x135   :  { %v2123_v19 = vpop.eup %2122 }
 0x136   :  { %v156_v20 = vmul.f32 %v2123_v19, %v148_v11 }
 0x138   :  { %v163_v21 = vmul.f32 %v161_v18, %v156_v20  ;;  %v658_v18 = vpop.permute.xlu1 %657 }
 0x13a   :  { %v170_v23 = vadd.f32 %v168_v22, %v163_v21 }
 0x13c   :  { %v172_v24 = vmul.f32 0.0, %v170_v23  ;;  %vm171_vm3 = vcmp.ge.f32.partialorder %v170_v23, 0.0 }
 0x13e   :  { %v173_v27 = vsel %vm171_vm3, %v170_v23, %v172_v24  ;;  %vm702_vm3 = vcmask 273552  }
 0x13f   :  { %1978 = vmatpush3.msk.msra.mxu0 %vm179_vm4, %v173_v27  ;;  %1983 = vmatpush3.msk.msra.mxu1 %vm179_vm4, %v173_v27 }
 0x140   :  { %1980 = vmatmul.mubr.msk.f32.vlgmr.msra.gmra.mxu0 %vm175_vm5, %v174_v25  ;;  %1985 = vmatmul.mubr.msk.f32.vlgmr.msra.gmra.mxu1 %vm175_vm5, %v1901_v26 }
 0x141   :  { %1987 = vmatprep.subr.mxu0 %v2148_v14  ;;  %1994 = vmatprep.subr.mxu1 %v2148_v14 }
 0x142   :  { %1988 = vmatpush3.msra.mxu0 %v1905_v28  ;;  %1995 = vmatpush3.msra.mxu1 %v254_v29  ;;  %v737_v28 = vld [vmem:[%s1874_s17] sm:$0xf] }
 0x143   :  { %1989 = vmatprep.subr.mxu0 %v2148_v14  ;;  %1996 = vmatprep.subr.mxu1 %v2148_v14 }
 0x144   :  { %1990 = vmatpush3.msra.mxu0 %v1904_v30  ;;  %1991 = vmatprep.mubr.msk.f32.mxu0 %vm2149_vm2, %v2148_v14 }
 0x145   :  { %1998 = vmatprep.mubr.msk.f32.mxu1 %vm2149_vm2, %v2148_v14  ;;  %2001 = vmatprep.subr.mxu0 %v2148_v14 }
 0x146   :  { %1997 = vmatpush3.msra.mxu1 %v253_v31 }
 0x147   :  { %2006 = vmatprep.subr.mxu1 %v2148_v14 }
 0x200   :  { %v249_v32 = vpop.f32.mrf.mxu0  ;;  %v326_v33 = vpop.f32.mrf.mxu1 }
 0x201   :  { %1992 = vmatmul.mubr.msk.f32.vlgmr.msra.gmra.mxu0 %vm333_vm6, %v326_v33  ;;  %1999 = vmatmul.mubr.msk.f32.vlgmr.msra.gmra.mxu1 %vm333_vm6, %v249_v32  ;;  %v835_v33 = vld [vmem:[%s1876_s21] sm:$0xf] }
 0x202   :  { %2002 = vmatpush3.msk.msra.mxu0 %vm179_vm4, %v173_v27  ;;  %v1986_v34 = vpop.f32.mrf.mxu1  ;;  %2003 = vmatprep.mubr.msk.f32.mxu0 %vm2149_vm2, %v2148_v14  ;;  %v1981_v36 = vpop.f32.mrf.mxu0 }
 0x203   :  { %2010 = vmatprep.mubr.msk.f32.mxu1 %vm2149_vm2, %v2148_v14  ;;  %2013 = vmatprep.subr.mxu0 %v2148_v14  ;;  %v865_v34 = vld [vmem:[%s1878_s25] sm:$0xf]  ;;  %s2180_s25 = smov 34  }
 0x204   :  { %2007 = vmatpush3.msra.mxu1 %v1912_v37  ;;  %s1898_s28 = sld [smem:[%s2577_s0 + %s2180_s25]]  }
 0x205   :  { %2004 = vmatmul.mubr.msk.f32.vlgmr.msra.gmra.mxu0 %vm175_vm5, %v1908_v35  ;;  %2008 = vmatprep.subr.mxu1 %v2148_v14 }
 0x206   :  { %2019 = vmatprep.mubr.msk.f32.mxu0 %vm2149_vm2, %v2148_v14  ;;  %2009 = vmatpush3.msra.mxu1 %v1911_v38 }
 0x207   :  { %2022 = vmatprep.subr.mxu1 %v2148_v14 }
 0x2c1   :  { %v403_v39 = vpop.f32.mrf.mxu0  ;;  %v476_v40 = vpop.f32.mrf.mxu1 }
 0x2c2   :  { %v477_v41 = vadd.f32 %v476_v40, %v403_v39  ;;  %v828_v40 = vld [vmem:[%s1875_s29] sm:$0xf] }
 0x2c3   :  { %v1993_v42 = vpop.f32.mrf.mxu0  ;;  %v2000_v43 = vpop.f32.mrf.mxu1 }
 0x2c5   :  { %v551_v44 = vpop.f32.mrf.mxu0 }
 0x2c6   :  { %2011 = vmatmul.mubr.msk.f32.vlgmr.msra.gmra.mxu1 %vm333_vm6, %v551_v44  ;;  %vm704_vm6 = vcmask 142472  }
 0x2c7   :  { %v2005_v45 = vpop.f32.mrf.mxu0  ;;  %2024 = vmatprep.mubr.msk.f32.mxu1 %vm2149_vm2, %v2148_v14 }
 0x386   :  { %v627_v49 = vpop.f32.mrf.mxu1 }
 0x387   :  { %v631_v50 = vadd.f32 %v627_v49, %v477_v41 }
 0x388   :  { %v2012_v52 = vpop.f32.mrf.mxu1 }
 0x389   :  { %2023 = vmatpush3.msk.msra.mxu1 %vm179_vm4, %v631_v50  ;;  %v634_v53 = vsel %vm633_vm1, %v631_v50, 0.0 }
 0x38a   :  { %635 = vadd.xlane.f32.xlu0 %v634_v53  ;;  %2027 = vmatprep.subr.mxu1 %v2148_v14  ;;  %v866_v53 = vld [vmem:[%s1879_s3] sm:$0xf] }
 0x38b   :  { %2025 = vmatmul.mubr.msk.f32.vlgmr.msra.gmra.mxu1 %vm175_vm5, %v865_v34 }
 0x38c   :  { %2028 = vmatpush3.msk.msra.mxu1 %vm179_vm4, %v2200_v5  ;;  %2029 = vmatprep.mubr.msk.f32.mxu1 %vm2149_vm2, %v2148_v14 }
 0x38d   :  { %2039 = vmatprep.subr.mxu1 %v2148_v14 }
 0x38e   :  { %671 = vadd.xlane.f32.xlu0 %v670_v54 }
 0x3a4   :  { %650 = vperm.xlu0 %2121, %v647_v55  }
 0x413   :  { %v636_v56 = vpop.xlane.xlu0 %635 }
 0x414   :  { %v637_v57 = vmul.f32 0.029411765, %v636_v56 }
 0x416   :  { %v638_v58 = vsub.f32 %v631_v50, %v637_v57 }
 0x417   :  { %v672_v62 = vpop.xlane.xlu0 %671 }
 0x418   :  { %v639_v59 = vmul.f32 %v638_v58, %v638_v58  ;;  %v673_v63 = vmul.f32 0.029411765, %v672_v62 }
 0x41a   :  { %v640_v60 = vsel %vm633_vm1, %v639_v59, 0.0  ;;  %v674_v0 = vadd.f32 1e-05, %v673_v63 }
 0x41b   :  { %641 = vadd.xlane.f32.xlu0 %v640_v60 }
 0x41c   :  { %2124 = vrsqrt.f32 %v674_v0 }
 0x41f   :  { %v651_v1 = vpop.permute.xlu0 %650 }
 0x429   :  { %v2125_v2 = vpop.eup %2124 }
 0x42a   :  { %v676_v7 = vmul.f32 %v2125_v2, %v668_v48 }
 0x42c   :  { %v683_v9 = vmul.f32 %v681_v8, %v676_v7 }
 0x431   :  { %687 = vperm.xlu0 %2121, %v684_v61  }
 0x44b   :  { %v939_v50 = vpop.f32.mrf.mxu1 }
 0x44d   :  { %v2026_v52 = vpop.f32.mrf.mxu1 }
 0x4a4   :  { %v642_v3 = vpop.xlane.xlu0 %641 }
 0x4a5   :  { %v643_v4 = vmul.f32 0.029411765, %v642_v3 }
 0x4a7   :  { %v644_v6 = vadd.f32 1e-05, %v643_v4 }
 0x4a9   :  { %2126 = vrsqrt.f32 %v644_v6  ;;  %v1124_v6 = vld [vmem:[%s1881_s13] sm:$0xf]  ;;  %s1886_s13 = sld [smem:[%s2577_s0 + %s2169_s9]]   ;;  %s2176_s9 = smov 30  }
 0x4ac   :  { %v688_v10 = vpop.permute.xlu0 %687 }
 0x4ad   :  { %v690_v11 = vadd.f32 %v688_v10, %v683_v9 }
 0x4af   :  { %vm691_vm7 = vcmp.ge.f32.partialorder %v690_v11, 0.0  ;;  %v692_v12 = vmul.f32 0.01, %v690_v11 }
 0x4b1   :  { %v693_v13 = vsel %vm691_vm7, %v690_v11, %v692_v12  ;;  %vm741_vm7 = vcmask 195584   ;;  %v1117_v12 = vld [vmem:[%s1880_s18] sm:$0xf]  ;;  %s1888_s18 = sld [smem:[%s2577_s0 + %s2170_s15]]   ;;  %s2177_s15 = smov 32  }
 0x4b2   :  { %730 = vrot.lane.b32.xlu0 %v693_v13, %s2154_s12  ;;  %718 = vst.msk [vmem:[#allocation2 + $0xc] sm:$0xf] %vm714_vm8, %v693_v13 }
 0x4b3   :  { %719 = vst.msk [vmem:[#allocation2 + $0xc] sm:$0xf] %vm716_vm9, %v693_v13 }
 0x4b6   :  { %v2127_v15 = vpop.eup %2126  ;;  %707 = vrot.lane.b32.xlu0 %v693_v13, %s2145_s14 }
 0x4b7   :  { %v646_v16 = vmul.f32 %v2127_v15, %v638_v58  ;;  %v862_v58 = vld [vmem:[%s1877_s8] sm:$0xf]  ;;  %s1887_s8 = sld [smem:[%s2577_s0 + %s2168_s5]]   ;;  %s2175_s5 = smov 28  }
 0x4b9   :  { %v653_v17 = vmul.f32 %v651_v1, %v646_v16 }
 0x4bb   :  { %v660_v19 = vadd.f32 %v658_v18, %v653_v17 }
 0x4bd   :  { %vm661_vm10 = vcmp.ge.f32.partialorder %v660_v19, 0.0  ;;  %v662_v20 = vmul.f32 0.01, %v660_v19 }
 0x4bf   :  { %v663_v21 = vsel %vm661_vm10, %v660_v19, %v662_v20 }
 0x4c0   :  { %720 = vrot.lane.b32.xlu1 %v663_v21, %s2154_s12  ;;  %715 = vst.msk [vmem:[#allocation2 + $0x8] sm:$0xf] %vm714_vm8, %v663_v21 }
 0x4c1   :  { %717 = vst.msk [vmem:[#allocation2 + $0x8] sm:$0xf] %vm716_vm9, %v663_v21 }
 0x4c4   :  { %695 = vrot.lane.b32.xlu1 %v663_v21, %s2145_s14 }
 0x4c8   :  { %v739_v27 = vld [vmem:[#allocation2 + $0x8] sm:$0xff] }
 0x524   :  { %v731_v22 = vpop.permute.xlu0 %730 }
 0x525   :  { %733 = vst.msk [vmem:[#allocation2 + $0x14] sm:$0xf] %vm143_vm0, %v731_v22 }
 0x526   :  { %734 = vst.msk [vmem:[#allocation2 + $0x14] sm:$0xf] %vm724_vm11, %v2148_v14 }
 0x527   :  { %735 = vst.msk [vmem:[#allocation2 + $0x14] sm:$0xf] %vm726_vm12, %v731_v22 }
 0x528   :  { %736 = vst.msk [vmem:[#allocation2 + $0x14] sm:$0xf] %vm728_vm13, %v2148_v14  ;;  %v708_v23 = vpop.permute.xlu0 %707 }
 0x529   :  { %710 = vst.msk [vmem:[#allocation2 + $0x4] sm:$0xf] %vm698_vm14, %v708_v23 }
 0x52a   :  { %711 = vst.msk [vmem:[#allocation2 + $0x4] sm:$0xf] %vm700_vm15, %v2148_v14 }
 0x52b   :  { %712 = vst.msk [vmem:[#allocation2 + $0x4] sm:$0xf] %vm702_vm3, %v708_v23 }
 0x52c   :  { %713 = vst.msk [vmem:[#allocation2 + $0x4] sm:$0xf] %vm704_vm6, %v2148_v14 }
 0x532   :  { %v721_v24 = vpop.permute.xlu1 %720 }
 0x533   :  { %723 = vst.msk [vmem:[#allocation2 + $0x10] sm:$0xf] %vm143_vm0, %v721_v24 }
 0x534   :  { %725 = vst.msk [vmem:[#allocation2 + $0x10] sm:$0xf] %vm724_vm11, %v2148_v14 }
 0x535   :  { %727 = vst.msk [vmem:[#allocation2 + $0x10] sm:$0xf] %vm726_vm12, %v721_v24 }
 0x536   :  { %729 = vst.msk [vmem:[#allocation2 + $0x10] sm:$0xf] %vm728_vm13, %v2148_v14  ;;  %v696_v25 = vpop.permute.xlu1 %695 }
 0x537   :  { %699 = vst.msk [vmem:[#allocation2] sm:$0xf] %vm698_vm14, %v696_v25 }
 0x538   :  { %701 = vst.msk [vmem:[#allocation2] sm:$0xf] %vm700_vm15, %v2148_v14 }
 0x539   :  { %703 = vst.msk [vmem:[#allocation2] sm:$0xf] %vm702_vm3, %v696_v25 }
 0x53a   :  { %705 = vst.msk [vmem:[#allocation2] sm:$0xf] %vm704_vm6, %v2148_v14 }
 0x53d   :  { %v740_v26 = vld [vmem:[#allocation2 + $0x10] sm:$0xff] }
 0x53e   :  { %2014 = vmatpush3.msra.mxu0 %v740_v26 }
 0x53f   :  { %2015 = vmatprep.subr.mxu0 %v2148_v14 }
 0x540   :  { %2016 = vmatpush3.msra.mxu0 %v739_v27 }
 0x541   :  { %v738_v29 = vld [vmem:[#allocation2] sm:$0xff]  ;;  %2017 = vmatprep.subr.mxu0 %v2148_v14 }
 0x542   :  { %2018 = vmatpush3.msra.mxu0 %v738_v29 }
 0x543   :  { %2020 = vmatmul.mubr.msk.f32.vlgmr.msra.gmra.mxu0 %vm741_vm7, %v737_v28  ;;  %2032 = vmatprep.subr.mxu0 %v2148_v14  ;;  %vm1027_vm7 = vcmask 97280   ;;  %v1151_v28 = vld [vmem:[%s1882_s22] sm:$0xf]  ;;  %s1890_s22 = sld [smem:[%s2577_s0 + %s2171_s19]]   ;;  %s2178_s19 = smov 31  }
 0x544   :  { %2036 = vmatprep.mubr.msk.f32.mxu0 %vm2149_vm2, %v2148_v14 }
 0x603   :  { %v811_v30 = vpop.f32.mrf.mxu0 }
 0x604   :  { %v815_v31 = vsel %vm633_vm1, %v811_v30, 0.0 }
 0x605   :  { %816 = vadd.xlane.f32.xlu1 %v815_v31  ;;  %v2021_v32 = vpop.f32.mrf.mxu0 }
 0x616   :  { %838 = vperm.xlu1 %2120, %v835_v33   ;;  %v1250_v33 = vld [vmem:[%s1884_s26] sm:$0xf]  ;;  %s1889_s26 = sld [smem:[%s2577_s0 + %s2172_s23]]  }
 0x68e   :  { %v817_v35 = vpop.xlane.xlu1 %816 }
 0x68f   :  { %v818_v36 = vmul.f32 0.029411765, %v817_v35 }
 0x691   :  { %v819_v37 = vsub.f32 %v811_v30, %v818_v36 }
 0x692   :  { %v839_v47 = vpop.permute.xlu1 %838 }
 0x693   :  { %v820_v38 = vmul.f32 %v819_v37, %v819_v37 }
 0x695   :  { %v821_v39 = vsel %vm633_vm1, %v820_v38, 0.0 }
 0x696   :  { %822 = vadd.xlane.f32.xlu0 %v821_v39  ;;  %v1243_v39 = vld [vmem:[%s1883_s30] sm:$0xf]  ;;  %s1891_s30 = sld [smem:[%s2577_s0 + %s2173_s27]]  }
 0x6ac   :  { %831 = vperm.xlu0 %2121, %v828_v40  }
 0x71f   :  { %v823_v5 = vpop.xlane.xlu0 %822 }
 0x720   :  { %v824_v41 = vmul.f32 0.029411765, %v823_v5 }
 0x722   :  { %v825_v42 = vadd.f32 1e-05, %v824_v41 }
 0x724   :  { %2128 = vrsqrt.f32 %v825_v42 }
 0x727   :  { %v832_v45 = vpop.permute.xlu0 %831 }
 0x731   :  { %v2129_v43 = vpop.eup %2128 }
 0x732   :  { %v827_v44 = vmul.f32 %v2129_v43, %v819_v37 }
 0x734   :  { %v834_v46 = vmul.f32 %v832_v45, %v827_v44 }
 0x736   :  { %v841_v48 = vadd.f32 %v839_v47, %v834_v46 }
 0x738   :  { %v843_v49 = vmul.f32 0.01, %v841_v48  ;;  %vm842_vm10 = vcmp.ge.f32.partialorder %v841_v48, 0.0 }
 0x73a   :  { %v844_v51 = vsel %vm842_vm10, %v841_v48, %v843_v49 }
 0x73b   :  { %846 = vrot.lane.b32.xlu0 %v844_v51, %s2145_s14  ;;  %853 = vst.msk [vmem:[#allocation2 + $0x4] sm:$0xf] %vm714_vm8, %v844_v51  ;;  %855 = vrot.lane.b32.xlu1 %v844_v51, %s2154_s12 }
 0x73c   :  { %854 = vst.msk [vmem:[#allocation2 + $0x4] sm:$0xf] %vm716_vm9, %v844_v51 }
 0x73f   :  { %945 = vperm.xlu0 %2121, %v866_v53   ;;  %949 = vrot.lane.b32.xlu1 %v865_v34, %s2160_s4  ;;  %s1885_s4 = sld [smem:[%s2577_s0 + %s2167_s1]]   ;;  %s2174_s1 = smov 29  }
 0x745   :  { %v1277_v53 = vld [vmem:[%s1885_s4] sm:$0xf]  ;;  %s1893_s4 = sld [smem:[%s2577_s0 + %s2174_s1]]  }
 0x7ad   :  { %v847_v54 = vpop.permute.xlu0 %846  ;;  %v856_v55 = vpop.permute.xlu1 %855 }
 0x7ae   :  { %849 = vst.msk [vmem:[#allocation2] sm:$0xf] %vm698_vm14, %v847_v54 }
 0x7af   :  { %858 = vst.msk [vmem:[#allocation2 + $0x8] sm:$0xf] %vm143_vm0, %v856_v55 }
 0x7b0   :  { %850 = vst.msk [vmem:[#allocation2] sm:$0xf] %vm700_vm15, %v2148_v14 }
 0x7b1   :  { %859 = vst.msk [vmem:[#allocation2 + $0x8] sm:$0xf] %vm724_vm11, %v2148_v14  ;;  %v950_v56 = vpop.permute.xlu1 %949 }
 0x7b2   :  { %851 = vst.msk [vmem:[#allocation2] sm:$0xf] %vm702_vm3, %v847_v54  ;;  %2030 = vmatmul.mubr.msk.f32.vlgmr.msra.gmra.mxu1 %vm175_vm5, %v950_v56 }
 0x7b3   :  { %860 = vst.msk [vmem:[#allocation2 + $0x8] sm:$0xf] %vm726_vm12, %v856_v55  ;;  %2043 = vmatprep.mubr.msk.f32.mxu1 %vm2149_vm2, %v2148_v14 }
 0x7b4   :  { %852 = vst.msk [vmem:[#allocation2] sm:$0xf] %vm704_vm6, %v2148_v14 }
 0x7b5   :  { %861 = vst.msk [vmem:[#allocation2 + $0x8] sm:$0xf] %vm728_vm13, %v2148_v14 }
 0x7ba   :  { %v946_v62 = vpop.permute.xlu0 %945 }
 0x7bb   :  { %v863_v59 = vld [vmem:[#allocation2] sm:$0xff]  ;;  %v948_v63 = vadd.f32 %v946_v62, %v939_v50 }
 0x7bc   :  { %v864_v57 = vld [vmem:[#allocation2 + $0x8] sm:$0xf] }
 0x7bd   :  { %2033 = vmatpush3.msk.msra.mxu0 %vm179_vm4, %v864_v57 }
 0x7be   :  { %2034 = vmatprep.subr.mxu0 %v2148_v14 }
 0x7bf   :  { %2035 = vmatpush3.msra.mxu0 %v863_v59  ;;  %v1376_v59 = vld [vmem:[%s1887_s8] sm:$0xf]  ;;  %s1892_s8 = sld [smem:[%s2577_s0 + %s2175_s5]]  }
 0x7c0   :  { %2037 = vmatmul.mubr.msk.f32.vlgmr.msra.gmra.mxu0 %vm1027_vm7, %v862_v58  ;;  %2046 = vmatprep.subr.mxu0 %v2148_v14 }
 0x7c1   :  { %2050 = vmatprep.mubr.msk.f32.mxu0 %vm2149_vm2, %v2148_v14 }
 0x872   :  { %v1022_v60 = vpop.f32.mrf.mxu1 }
 0x873   :  { %v1026_v0 = vadd.f32 %v1022_v60, %v948_v63 }
 0x874   :  { %v2031_v61 = vpop.f32.mrf.mxu1 }
 0x880   :  { %v1100_v1 = vpop.f32.mrf.mxu0 }
 0x881   :  { %v2366_v2 = vadd.f32 %v1100_v1, %v1026_v0  ;;  %v1369_v1 = vld [vmem:[%s1886_s13] sm:$0xf]  ;;  %s1894_s13 = sld [smem:[%s2577_s0 + %s2176_s9]]  }
 0x882   :  { %v2038_v3 = vpop.f32.mrf.mxu0 }
 0x883   :  { %v1104_v4 = vsel %vm633_vm1, %v2366_v2, 0.0 }
 0x884   :  { %1105 = vadd.xlane.f32.xlu1 %v1104_v4 }
 0x895   :  { %1127 = vperm.xlu1 %2120, %v1124_v6  }
 0x90d   :  { %v1106_v7 = vpop.xlane.xlu1 %1105 }
 0x90e   :  { %v1107_v8 = vmul.f32 0.029411765, %v1106_v7 }
 0x910   :  { %v1108_v9 = vsub.f32 %v2366_v2, %v1107_v8 }
 0x911   :  { %v1128_v21 = vpop.permute.xlu1 %1127 }
 0x912   :  { %v1109_v10 = vmul.f32 %v1108_v9, %v1108_v9 }
 0x914   :  { %v1110_v11 = vsel %vm633_vm1, %v1109_v10, 0.0 }
 0x915   :  { %1111 = vadd.xlane.f32.xlu0 %v1110_v11 }
 0x92b   :  { %1120 = vperm.xlu0 %2121, %v1117_v12  }
 0x99e   :  { %v1112_v13 = vpop.xlane.xlu0 %1111 }
 0x99f   :  { %v1113_v15 = vmul.f32 0.029411765, %v1112_v13 }
 0x9a1   :  { %v1114_v16 = vadd.f32 1e-05, %v1113_v15 }
 0x9a3   :  { %2130 = vrsqrt.f32 %v1114_v16 }
 0x9a6   :  { %v1121_v19 = vpop.permute.xlu0 %1120 }
 0x9b0   :  { %v2131_v17 = vpop.eup %2130 }
 0x9b1   :  { %v1116_v18 = vmul.f32 %v2131_v17, %v1108_v9 }
 0x9b3   :  { %v1123_v20 = vmul.f32 %v1121_v19, %v1116_v18  ;;  %v1403_v18 = vld [vmem:[%s1888_s18] sm:$0xf]  ;;  %s1896_s18 = sld [smem:[%s2577_s0 + %s2177_s15]]  }
 0x9b5   :  { %v1130_v22 = vadd.f32 %v1128_v21, %v1123_v20 }
 0x9b7   :  { %v1132_v23 = vmul.f32 0.01, %v1130_v22  ;;  %vm1131_vm5 = vcmp.ge.f32.partialorder %v1130_v22, 0.0 }
 0x9b9   :  { %v1133_v24 = vsel %vm1131_vm5, %v1130_v22, %v1132_v23  ;;  %v1502_v23 = vld [vmem:[%s1890_s22] sm:$0xf]  ;;  %s1895_s22 = sld [smem:[%s2577_s0 + %s2178_s19]]  }
 0x9ba   :  { %1135 = vrot.lane.b32.xlu0 %v1133_v24, %s2145_s14  ;;  %1142 = vst.msk [vmem:[#allocation2 + $0x4] sm:$0xf] %vm714_vm8, %v1133_v24  ;;  %1144 = vrot.lane.b32.xlu1 %v1133_v24, %s2154_s12 }
 0x9bb   :  { %1143 = vst.msk [vmem:[#allocation2 + $0x4] sm:$0xf] %vm716_vm9, %v1133_v24 }
 0xa2c   :  { %v1136_v25 = vpop.permute.xlu0 %1135  ;;  %v1145_v26 = vpop.permute.xlu1 %1144 }
 0xa2d   :  { %1138 = vst.msk [vmem:[#allocation2] sm:$0xf] %vm698_vm14, %v1136_v25 }
 0xa2e   :  { %1147 = vst.msk [vmem:[#allocation2 + $0x8] sm:$0xf] %vm143_vm0, %v1145_v26 }
 0xa2f   :  { %1139 = vst.msk [vmem:[#allocation2] sm:$0xf] %vm700_vm15, %v2148_v14 }
 0xa30   :  { %1148 = vst.msk [vmem:[#allocation2 + $0x8] sm:$0xf] %vm724_vm11, %v2148_v14 }
 0xa31   :  { %1140 = vst.msk [vmem:[#allocation2] sm:$0xf] %vm702_vm3, %v1136_v25 }
 0xa32   :  { %1149 = vst.msk [vmem:[#allocation2 + $0x8] sm:$0xf] %vm726_vm12, %v1145_v26 }
 0xa33   :  { %1141 = vst.msk [vmem:[#allocation2] sm:$0xf] %vm704_vm6, %v2148_v14 }
 0xa34   :  { %1150 = vst.msk [vmem:[#allocation2 + $0x8] sm:$0xf] %vm728_vm13, %v2148_v14 }
 0xa3a   :  { %v1152_v29 = vld [vmem:[#allocation2] sm:$0xff] }
 0xa3b   :  { %v1153_v27 = vld [vmem:[#allocation2 + $0x8] sm:$0xf] }
 0xa3c   :  { %2040 = vmatpush3.msk.msra.mxu1 %vm179_vm4, %v1153_v27 }
 0xa3d   :  { %2041 = vmatprep.subr.mxu1 %v2148_v14 }
 0xa3e   :  { %2042 = vmatpush3.msra.mxu1 %v1152_v29  ;;  %v1495_v29 = vld [vmem:[%s1889_s26] sm:$0xf] }
 0xa3f   :  { %2044 = vmatmul.mubr.msk.f32.vlgmr.msra.gmra.mxu1 %vm1027_vm7, %v1151_v28  ;;  %2053 = vmatprep.subr.mxu1 %v2148_v14 }
 0xa40   :  { %2057 = vmatprep.mubr.msk.f32.mxu1 %vm2149_vm2, %v2148_v14 }
 0xaff   :  { %v1226_v30 = vpop.f32.mrf.mxu1 }
 0xb00   :  { %v1230_v31 = vsel %vm633_vm1, %v1226_v30, 0.0 }
 0xb01   :  { %1231 = vadd.xlane.f32.xlu1 %v1230_v31  ;;  %v2045_v32 = vpop.f32.mrf.mxu1 }
 0xb12   :  { %1253 = vperm.xlu1 %2120, %v1250_v33  }
 0xb8a   :  { %v1232_v34 = vpop.xlane.xlu1 %1231 }
 0xb8b   :  { %v1233_v35 = vmul.f32 0.029411765, %v1232_v34 }
 0xb8d   :  { %v1234_v36 = vsub.f32 %v1226_v30, %v1233_v35 }
 0xb8e   :  { %v1254_v46 = vpop.permute.xlu1 %1253 }
 0xb8f   :  { %v1235_v37 = vmul.f32 %v1234_v36, %v1234_v36 }
 0xb91   :  { %v1236_v38 = vsel %vm633_vm1, %v1235_v37, 0.0 }
 0xb92   :  { %1237 = vadd.xlane.f32.xlu0 %v1236_v38 }
 0xba8   :  { %1246 = vperm.xlu0 %2121, %v1243_v39  }
 0xc1b   :  { %v1238_v40 = vpop.xlane.xlu0 %1237 }
 0xc1c   :  { %v1239_v5 = vmul.f32 0.029411765, %v1238_v40 }
 0xc1e   :  { %v1240_v41 = vadd.f32 1e-05, %v1239_v5 }
 0xc20   :  { %2132 = vrsqrt.f32 %v1240_v41 }
 0xc23   :  { %v1247_v44 = vpop.permute.xlu0 %1246 }
 0xc2d   :  { %v2133_v42 = vpop.eup %2132 }
 0xc2e   :  { %v1242_v43 = vmul.f32 %v2133_v42, %v1234_v36 }
 0xc30   :  { %v1249_v45 = vmul.f32 %v1247_v44, %v1242_v43  ;;  %v1529_v43 = vld [vmem:[%s1891_s30] sm:$0xf] }
 0xc32   :  { %v1256_v47 = vadd.f32 %v1254_v46, %v1249_v45 }
 0xc34   :  { %v1258_v48 = vmul.f32 0.01, %v1256_v47  ;;  %vm1257_vm10 = vcmp.ge.f32.partialorder %v1256_v47, 0.0 }
 0xc36   :  { %v1259_v49 = vsel %vm1257_vm10, %v1256_v47, %v1258_v48 }
 0xc37   :  { %1261 = vrot.lane.b32.xlu0 %v1259_v49, %s2145_s14  ;;  %1268 = vst.msk [vmem:[#allocation2 + $0x4] sm:$0xf] %vm714_vm8, %v1259_v49  ;;  %1270 = vrot.lane.b32.xlu1 %v1259_v49, %s2154_s12 }
 0xc38   :  { %1269 = vst.msk [vmem:[#allocation2 + $0x4] sm:$0xf] %vm716_vm9, %v1259_v49  ;;  %v1628_v49 = vld [vmem:[%s1893_s4] sm:$0xf] }
 0xca9   :  { %v1262_v50 = vpop.permute.xlu0 %1261  ;;  %v1271_v51 = vpop.permute.xlu1 %1270 }
 0xcaa   :  { %1264 = vst.msk [vmem:[#allocation2] sm:$0xf] %vm698_vm14, %v1262_v50 }
 0xcab   :  { %1273 = vst.msk [vmem:[#allocation2 + $0x8] sm:$0xf] %vm143_vm0, %v1271_v51 }
 0xcac   :  { %1265 = vst.msk [vmem:[#allocation2] sm:$0xf] %vm700_vm15, %v2148_v14 }
 0xcad   :  { %1274 = vst.msk [vmem:[#allocation2 + $0x8] sm:$0xf] %vm724_vm11, %v2148_v14 }
 0xcae   :  { %1266 = vst.msk [vmem:[#allocation2] sm:$0xf] %vm702_vm3, %v1262_v50 }
 0xcaf   :  { %1275 = vst.msk [vmem:[#allocation2 + $0x8] sm:$0xf] %vm726_vm12, %v1271_v51 }
 0xcb0   :  { %1267 = vst.msk [vmem:[#allocation2] sm:$0xf] %vm704_vm6, %v2148_v14 }
 0xcb1   :  { %1276 = vst.msk [vmem:[#allocation2 + $0x8] sm:$0xf] %vm728_vm13, %v2148_v14 }
 0xcb7   :  { %v1278_v54 = vld [vmem:[#allocation2] sm:$0xff] }
 0xcb8   :  { %v1279_v52 = vld [vmem:[#allocation2 + $0x8] sm:$0xf] }
 0xcb9   :  { %2047 = vmatpush3.msk.msra.mxu0 %vm179_vm4, %v1279_v52 }
 0xcba   :  { %2048 = vmatprep.subr.mxu0 %v2148_v14 }
 0xcbb   :  { %2049 = vmatpush3.msra.mxu0 %v1278_v54 }
 0xcbc   :  { %2051 = vmatmul.mubr.msk.f32.vlgmr.msra.gmra.mxu0 %vm1027_vm7, %v1277_v53  ;;  %2060 = vmatprep.subr.mxu0 %v2148_v14 }
 0xcbd   :  { %2064 = vmatprep.mubr.msk.f32.mxu0 %vm2149_vm2, %v2148_v14 }
 0xd7c   :  { %v1352_v55 = vpop.f32.mrf.mxu0 }
 0xd7d   :  { %v2437_v56 = vadd.f32 %v1352_v55, %v2366_v2  ;;  %v1621_v55 = vld [vmem:[%s1892_s8] sm:$0xf] }
 0xd7e   :  { %v2052_v57 = vpop.f32.mrf.mxu0 }
 0xd7f   :  { %v1356_v58 = vsel %vm633_vm1, %v2437_v56, 0.0 }
 0xd80   :  { %1357 = vadd.xlane.f32.xlu1 %v1356_v58 }
 0xd91   :  { %1379 = vperm.xlu1 %2120, %v1376_v59  }
 0xe09   :  { %v1358_v60 = vpop.xlane.xlu1 %1357 }
 0xe0a   :  { %v1359_v61 = vmul.f32 0.029411765, %v1358_v60 }
 0xe0c   :  { %v1360_v62 = vsub.f32 %v2437_v56, %v1359_v61 }
 0xe0d   :  { %v1380_v10 = vpop.permute.xlu1 %1379 }
 0xe0e   :  { %v1361_v63 = vmul.f32 %v1360_v62, %v1360_v62 }
 0xe10   :  { %v1362_v0 = vsel %vm633_vm1, %v1361_v63, 0.0 }
 0xe11   :  { %1363 = vadd.xlane.f32.xlu0 %v1362_v0 }
 0xe27   :  { %1372 = vperm.xlu0 %2121, %v1369_v1  }
 0xe9a   :  { %v1364_v2 = vpop.xlane.xlu0 %1363 }
 0xe9b   :  { %v1365_v3 = vmul.f32 0.029411765, %v1364_v2 }
 0xe9d   :  { %v1366_v4 = vadd.f32 1e-05, %v1365_v3 }
 0xe9f   :  { %2134 = vrsqrt.f32 %v1366_v4 }
 0xea2   :  { %v1373_v8 = vpop.permute.xlu0 %1372 }
 0xeac   :  { %v2135_v6 = vpop.eup %2134 }
 0xead   :  { %v1368_v7 = vmul.f32 %v2135_v6, %v1360_v62 }
 0xeaf   :  { %v1375_v9 = vmul.f32 %v1373_v8, %v1368_v7  ;;  %v1655_v7 = vld [vmem:[%s1894_s13] sm:$0xf] }
 0xeb1   :  { %v1382_v11 = vadd.f32 %v1380_v10, %v1375_v9 }
 0xeb3   :  { %v1384_v12 = vmul.f32 0.01, %v1382_v11  ;;  %vm1383_vm5 = vcmp.ge.f32.partialorder %v1382_v11, 0.0 }
 0xeb5   :  { %v1385_v13 = vsel %vm1383_vm5, %v1382_v11, %v1384_v12  ;;  %v1754_v12 = vld [vmem:[%s1896_s18] sm:$0xf] }
 0xeb6   :  { %1387 = vrot.lane.b32.xlu0 %v1385_v13, %s2145_s14  ;;  %1394 = vst.msk [vmem:[#allocation2 + $0x4] sm:$0xf] %vm714_vm8, %v1385_v13  ;;  %1396 = vrot.lane.b32.xlu1 %v1385_v13, %s2154_s12 }
 0xeb7   :  { %1395 = vst.msk [vmem:[#allocation2 + $0x4] sm:$0xf] %vm716_vm9, %v1385_v13 }
 0xf28   :  { %v1388_v15 = vpop.permute.xlu0 %1387  ;;  %v1397_v16 = vpop.permute.xlu1 %1396 }
 0xf29   :  { %1390 = vst.msk [vmem:[#allocation2] sm:$0xf] %vm698_vm14, %v1388_v15 }
 0xf2a   :  { %1399 = vst.msk [vmem:[#allocation2 + $0x8] sm:$0xf] %vm143_vm0, %v1397_v16 }
 0xf2b   :  { %1391 = vst.msk [vmem:[#allocation2] sm:$0xf] %vm700_vm15, %v2148_v14 }
 0xf2c   :  { %1400 = vst.msk [vmem:[#allocation2 + $0x8] sm:$0xf] %vm724_vm11, %v2148_v14 }
 0xf2d   :  { %1392 = vst.msk [vmem:[#allocation2] sm:$0xf] %vm702_vm3, %v1388_v15 }
 0xf2e   :  { %1401 = vst.msk [vmem:[#allocation2 + $0x8] sm:$0xf] %vm726_vm12, %v1397_v16 }
 0xf2f   :  { %1393 = vst.msk [vmem:[#allocation2] sm:$0xf] %vm704_vm6, %v2148_v14 }
 0xf30   :  { %1402 = vst.msk [vmem:[#allocation2 + $0x8] sm:$0xf] %vm728_vm13, %v2148_v14 }
 0xf36   :  { %v1404_v19 = vld [vmem:[#allocation2] sm:$0xff] }
 0xf37   :  { %v1405_v17 = vld [vmem:[#allocation2 + $0x8] sm:$0xf] }
 0xf38   :  { %2054 = vmatpush3.msk.msra.mxu1 %vm179_vm4, %v1405_v17 }
 0xf39   :  { %2055 = vmatprep.subr.mxu1 %v2148_v14 }
 0xf3a   :  { %2056 = vmatpush3.msra.mxu1 %v1404_v19  ;;  %v1747_v19 = vld [vmem:[%s1895_s22] sm:$0xf] }
 0xf3b   :  { %2058 = vmatmul.mubr.msk.f32.vlgmr.msra.gmra.mxu1 %vm1027_vm7, %v1403_v18  ;;  %2067 = vmatprep.subr.mxu1 %v2148_v14 }
 0xf3c   :  { %2071 = vmatprep.mubr.msk.f32.mxu1 %vm2149_vm2, %v2148_v14 }
 0xffb   :  { %v1478_v20 = vpop.f32.mrf.mxu1 }
 0xffc   :  { %v1482_v21 = vsel %vm633_vm1, %v1478_v20, 0.0 }
 0xffd   :  { %1483 = vadd.xlane.f32.xlu1 %v1482_v21  ;;  %v2059_v22 = vpop.f32.mrf.mxu1 }
0x100e   :  { %1505 = vperm.xlu1 %2120, %v1502_v23  }
0x1086   :  { %v1484_v24 = vpop.xlane.xlu1 %1483 }
0x1087   :  { %v1485_v25 = vmul.f32 0.029411765, %v1484_v24 }
0x1089   :  { %v1486_v26 = vsub.f32 %v1478_v20, %v1485_v25 }
0x108a   :  { %v1506_v37 = vpop.permute.xlu1 %1505 }
0x108b   :  { %v1487_v27 = vmul.f32 %v1486_v26, %v1486_v26 }
0x108d   :  { %v1488_v28 = vsel %vm633_vm1, %v1487_v27, 0.0 }
0x108e   :  { %1489 = vadd.xlane.f32.xlu0 %v1488_v28 }
0x10a4   :  { %1498 = vperm.xlu0 %2121, %v1495_v29  }
0x1117   :  { %v1490_v30 = vpop.xlane.xlu0 %1489 }
0x1118   :  { %v1491_v31 = vmul.f32 0.029411765, %v1490_v30 }
0x111a   :  { %v1492_v32 = vadd.f32 1e-05, %v1491_v31 }
0x111c   :  { %2136 = vrsqrt.f32 %v1492_v32 }
0x111f   :  { %v1499_v35 = vpop.permute.xlu0 %1498 }
0x1129   :  { %v2137_v33 = vpop.eup %2136 }
0x112a   :  { %v1494_v34 = vmul.f32 %v2137_v33, %v1486_v26 }
0x112c   :  { %v1501_v36 = vmul.f32 %v1499_v35, %v1494_v34 }
0x112e   :  { %v1508_v38 = vadd.f32 %v1506_v37, %v1501_v36 }
0x1130   :  { %v1510_v39 = vmul.f32 0.01, %v1508_v38  ;;  %vm1509_vm10 = vcmp.ge.f32.partialorder %v1508_v38, 0.0 }
0x1132   :  { %v1511_v40 = vsel %vm1509_vm10, %v1508_v38, %v1510_v39 }
0x1133   :  { %1513 = vrot.lane.b32.xlu0 %v1511_v40, %s2145_s14  ;;  %1520 = vst.msk [vmem:[#allocation2 + $0x4] sm:$0xf] %vm714_vm8, %v1511_v40  ;;  %1522 = vrot.lane.b32.xlu1 %v1511_v40, %s2154_s12 }
0x1134   :  { %1521 = vst.msk [vmem:[#allocation2 + $0x4] sm:$0xf] %vm716_vm9, %v1511_v40 }
0x11a5   :  { %v1514_v5 = vpop.permute.xlu0 %1513  ;;  %v1523_v41 = vpop.permute.xlu1 %1522 }
0x11a6   :  { %1516 = vst.msk [vmem:[#allocation2] sm:$0xf] %vm698_vm14, %v1514_v5 }
0x11a7   :  { %1525 = vst.msk [vmem:[#allocation2 + $0x8] sm:$0xf] %vm143_vm0, %v1523_v41 }
0x11a8   :  { %1517 = vst.msk [vmem:[#allocation2] sm:$0xf] %vm700_vm15, %v2148_v14 }
0x11a9   :  { %1526 = vst.msk [vmem:[#allocation2 + $0x8] sm:$0xf] %vm724_vm11, %v2148_v14 }
0x11aa   :  { %1518 = vst.msk [vmem:[#allocation2] sm:$0xf] %vm702_vm3, %v1514_v5 }
0x11ab   :  { %1527 = vst.msk [vmem:[#allocation2 + $0x8] sm:$0xf] %vm726_vm12, %v1523_v41 }
0x11ac   :  { %1519 = vst.msk [vmem:[#allocation2] sm:$0xf] %vm704_vm6, %v2148_v14 }
0x11ad   :  { %1528 = vst.msk [vmem:[#allocation2 + $0x8] sm:$0xf] %vm728_vm13, %v2148_v14 }
0x11b3   :  { %v1530_v44 = vld [vmem:[#allocation2] sm:$0xff] }
0x11b4   :  { %v1531_v42 = vld [vmem:[#allocation2 + $0x8] sm:$0xf] }
0x11b5   :  { %2061 = vmatpush3.msk.msra.mxu0 %vm179_vm4, %v1531_v42 }
0x11b6   :  { %2062 = vmatprep.subr.mxu0 %v2148_v14 }
0x11b7   :  { %2063 = vmatpush3.msra.mxu0 %v1530_v44 }
0x11b8   :  { %2065 = vmatmul.mubr.msk.f32.vlgmr.msra.gmra.mxu0 %vm1027_vm7, %v1529_v43  ;;  %2074 = vmatprep.subr.mxu0 %v2148_v14 }
0x11b9   :  { %2078 = vmatprep.mubr.msk.f32.mxu0 %vm2149_vm2, %v2148_v14 }
0x1278   :  { %v1604_v45 = vpop.f32.mrf.mxu0 }
0x1279   :  { %v2508_v46 = vadd.f32 %v1604_v45, %v2437_v56 }
0x127a   :  { %v2066_v47 = vpop.f32.mrf.mxu0 }
0x127b   :  { %v1608_v48 = vsel %vm633_vm1, %v2508_v46, 0.0 }
0x127c   :  { %1609 = vadd.xlane.f32.xlu1 %v1608_v48 }
0x128d   :  { %1631 = vperm.xlu1 %2120, %v1628_v49  }
0x1305   :  { %v1610_v50 = vpop.xlane.xlu1 %1609 }
0x1306   :  { %v1611_v51 = vmul.f32 0.029411765, %v1610_v50 }
0x1308   :  { %v1612_v52 = vsub.f32 %v2508_v46, %v1611_v51 }
0x1309   :  { %v1632_v63 = vpop.permute.xlu1 %1631 }
0x130a   :  { %v1613_v53 = vmul.f32 %v1612_v52, %v1612_v52 }
0x130c   :  { %v1614_v54 = vsel %vm633_vm1, %v1613_v53, 0.0 }
0x130d   :  { %1615 = vadd.xlane.f32.xlu0 %v1614_v54 }
0x1323   :  { %1624 = vperm.xlu0 %2121, %v1621_v55  }
0x1396   :  { %v1616_v56 = vpop.xlane.xlu0 %1615 }
0x1397   :  { %v1617_v57 = vmul.f32 0.029411765, %v1616_v56 }
0x1399   :  { %v1618_v58 = vadd.f32 1e-05, %v1617_v57 }
0x139b   :  { %2138 = vrsqrt.f32 %v1618_v58 }
0x139e   :  { %v1625_v61 = vpop.permute.xlu0 %1624 }
0x13a8   :  { %v2139_v59 = vpop.eup %2138 }
0x13a9   :  { %v1620_v60 = vmul.f32 %v2139_v59, %v1612_v52 }
0x13ab   :  { %v1627_v62 = vmul.f32 %v1625_v61, %v1620_v60 }
0x13ad   :  { %v1634_v0 = vadd.f32 %v1632_v63, %v1627_v62 }
0x13af   :  { %v1636_v1 = vmul.f32 0.01, %v1634_v0  ;;  %vm1635_vm2 = vcmp.ge.f32.partialorder %v1634_v0, 0.0 }
0x13b1   :  { %v1637_v2 = vsel %vm1635_vm2, %v1634_v0, %v1636_v1 }
0x13b2   :  { %1639 = vrot.lane.b32.xlu0 %v1637_v2, %s2145_s14  ;;  %1646 = vst.msk [vmem:[#allocation2 + $0x4] sm:$0xf] %vm714_vm8, %v1637_v2  ;;  %1648 = vrot.lane.b32.xlu1 %v1637_v2, %s2154_s12 }
0x13b3   :  { %1647 = vst.msk [vmem:[#allocation2 + $0x4] sm:$0xf] %vm716_vm9, %v1637_v2 }
0x1424   :  { %v1640_v3 = vpop.permute.xlu0 %1639  ;;  %v1649_v4 = vpop.permute.xlu1 %1648 }
0x1425   :  { %1642 = vst.msk [vmem:[#allocation2] sm:$0xf] %vm698_vm14, %v1640_v3 }
0x1426   :  { %1651 = vst.msk [vmem:[#allocation2 + $0x8] sm:$0xf] %vm143_vm0, %v1649_v4 }
0x1427   :  { %1643 = vst.msk [vmem:[#allocation2] sm:$0xf] %vm700_vm15, %v2148_v14 }
0x1428   :  { %1652 = vst.msk [vmem:[#allocation2 + $0x8] sm:$0xf] %vm724_vm11, %v2148_v14 }
0x1429   :  { %1644 = vst.msk [vmem:[#allocation2] sm:$0xf] %vm702_vm3, %v1640_v3 }
0x142a   :  { %1653 = vst.msk [vmem:[#allocation2 + $0x8] sm:$0xf] %vm726_vm12, %v1649_v4 }
0x142b   :  { %1645 = vst.msk [vmem:[#allocation2] sm:$0xf] %vm704_vm6, %v2148_v14 }
0x142c   :  { %1654 = vst.msk [vmem:[#allocation2 + $0x8] sm:$0xf] %vm728_vm13, %v2148_v14 }
0x1432   :  { %v1656_v8 = vld [vmem:[#allocation2] sm:$0xff] }
0x1433   :  { %v1657_v6 = vld [vmem:[#allocation2 + $0x8] sm:$0xf] }
0x1434   :  { %2068 = vmatpush3.msk.msra.mxu1 %vm179_vm4, %v1657_v6 }
0x1435   :  { %2069 = vmatprep.subr.mxu1 %v2148_v14 }
0x1436   :  { %2070 = vmatpush3.msra.mxu1 %v1656_v8 }
0x1437   :  { %2072 = vmatmul.mubr.msk.f32.vlgmr.msra.gmra.mxu1 %vm1027_vm7, %v1655_v7 }
0x14f7   :  { %v1730_v9 = vpop.f32.mrf.mxu1 }
0x14f8   :  { %v1734_v10 = vsel %vm633_vm1, %v1730_v9, 0.0 }
0x14f9   :  { %1735 = vadd.xlane.f32.xlu1 %v1734_v10  ;;  %v2073_v11 = vpop.f32.mrf.mxu1 }
0x150a   :  { %1757 = vperm.xlu1 %2120, %v1754_v12  }
0x1582   :  { %v1736_v13 = vpop.xlane.xlu1 %1735 }
0x1583   :  { %v1737_v15 = vmul.f32 0.029411765, %v1736_v13 }
0x1585   :  { %v1738_v16 = vsub.f32 %v1730_v9, %v1737_v15 }
0x1586   :  { %v1758_v27 = vpop.permute.xlu1 %1757 }
0x1587   :  { %v1739_v17 = vmul.f32 %v1738_v16, %v1738_v16 }
0x1589   :  { %v1740_v18 = vsel %vm633_vm1, %v1739_v17, 0.0 }
0x158a   :  { %1741 = vadd.xlane.f32.xlu0 %v1740_v18 }
0x15a0   :  { %1750 = vperm.xlu0 %2121, %v1747_v19  }
0x1613   :  { %v1742_v20 = vpop.xlane.xlu0 %1741 }
0x1614   :  { %v1743_v21 = vmul.f32 0.029411765, %v1742_v20 }
0x1616   :  { %v1744_v22 = vadd.f32 1e-05, %v1743_v21 }
0x1618   :  { %2140 = vrsqrt.f32 %v1744_v22 }
0x161b   :  { %v1751_v25 = vpop.permute.xlu0 %1750 }
0x1625   :  { %v2141_v23 = vpop.eup %2140 }
0x1626   :  { %v1746_v24 = vmul.f32 %v2141_v23, %v1738_v16 }
0x1628   :  { %v1753_v26 = vmul.f32 %v1751_v25, %v1746_v24 }
0x162a   :  { %v1760_v28 = vadd.f32 %v1758_v27, %v1753_v26 }
0x162c   :  { %v1762_v29 = vmul.f32 0.01, %v1760_v28  ;;  %vm1761_vm5 = vcmp.ge.f32.partialorder %v1760_v28, 0.0 }
0x162e   :  { %v1763_v30 = vsel %vm1761_vm5, %v1760_v28, %v1762_v29 }
0x162f   :  { %1765 = vrot.lane.b32.xlu0 %v1763_v30, %s2145_s14  ;;  %1772 = vst.msk [vmem:[#allocation2 + $0x4] sm:$0xf] %vm714_vm8, %v1763_v30  ;;  %1774 = vrot.lane.b32.xlu1 %v1763_v30, %s2154_s12  ;;  %s2179_s14 = smov 33  }
0x1630   :  { %1773 = vst.msk [vmem:[#allocation2 + $0x4] sm:$0xf] %vm716_vm9, %v1763_v30  ;;  %s1897_s24 = sld [smem:[%s2577_s0 + %s2179_s14]]  }
0x1636   :  { %v1781_v34 = vld [vmem:[%s1897_s24] sm:$0xf] }
0x16a1   :  { %v1766_v31 = vpop.permute.xlu0 %1765  ;;  %v1775_v32 = vpop.permute.xlu1 %1774 }
0x16a2   :  { %1768 = vst.msk [vmem:[#allocation2] sm:$0xf] %vm698_vm14, %v1766_v31 }
0x16a3   :  { %1777 = vst.msk [vmem:[#allocation2 + $0x8] sm:$0xf] %vm143_vm0, %v1775_v32 }
0x16a4   :  { %1769 = vst.msk [vmem:[#allocation2] sm:$0xf] %vm700_vm15, %v2148_v14 }
0x16a5   :  { %1778 = vst.msk [vmem:[#allocation2 + $0x8] sm:$0xf] %vm724_vm11, %v2148_v14 }
0x16a6   :  { %1770 = vst.msk [vmem:[#allocation2] sm:$0xf] %vm702_vm3, %v1766_v31 }
0x16a7   :  { %1779 = vst.msk [vmem:[#allocation2 + $0x8] sm:$0xf] %vm726_vm12, %v1775_v32 }
0x16a8   :  { %1771 = vst.msk [vmem:[#allocation2] sm:$0xf] %vm704_vm6, %v2148_v14 }
0x16a9   :  { %1780 = vst.msk [vmem:[#allocation2 + $0x8] sm:$0xf] %vm728_vm13, %v2148_v14 }
0x16af   :  { %v1782_v35 = vld [vmem:[#allocation2] sm:$0xff] }
0x16b0   :  { %v1783_v33 = vld [vmem:[#allocation2 + $0x8] sm:$0xf] }
0x16b1   :  { %2075 = vmatpush3.msk.msra.mxu0 %vm179_vm4, %v1783_v33 }
0x16b2   :  { %2076 = vmatprep.subr.mxu0 %v2148_v14 }
0x16b3   :  { %2077 = vmatpush3.msra.mxu0 %v1782_v35 }
0x16b4   :  { %2079 = vmatmul.mubr.msk.f32.vlgmr.msra.gmra.mxu0 %vm1027_vm7, %v1781_v34 }
0x1774   :  { %v1856_v36 = vpop.f32.mrf.mxu0 }
0x1775   :  { %v1857_v37 = vadd.f32 %v1856_v36, %v2508_v46 }
0x1776   :  { %v2080_v38 = vpop.f32.mrf.mxu0 }
0x1777   :  { %1860 = vst.msk [vmem:[%s1898_s28] sm:$0xf] %vm633_vm1, %v1857_v37 }

</bundles_post_ra>
